<compile_context>
chip_gen: v5e
topology: v5e:2x2
jax: 0.10.0
libtpu: 0.0.40
codegen_flags: <defaults>
</compile_context>

<pallas_src>
import functools

import jax
import jax.numpy as jnp
from jax.experimental import pallas as pl
from jax.experimental.pallas import tpu as pltpu


def _round_up(x: int, m: int) -> int:
    return ((x + m - 1) // m) * m


def _make_actor_kernel(n_layers: int, state_dim: int, compute_dtype):
    """Ref order:
       state, goal, W0, hidden_biases, W_1..W_{n-1}, W_out, tail(b_out/bounds/offset),
       out, xcat_scratch
    """

    def kernel(*refs):
        state_ref, goal_ref, w0_ref, hb_ref = refs[:4]
        hidden_w_refs = refs[4:4 + (n_layers - 1)]
        w_out_ref = refs[4 + (n_layers - 1)]
        tail_ref = refs[5 + (n_layers - 1)]
        out_ref = refs[6 + (n_layers - 1)]
        xcat_ref = refs[7 + (n_layers - 1)]

        # --- layer 0: concat fused via VMEM scratch -> one K=2*S MXU push ----
        xcat_ref[:, :state_dim] = state_ref[...]
        xcat_ref[:, state_dim:] = goal_ref[...]
        h = (jnp.dot(xcat_ref[...], w0_ref[...],
                     preferred_element_type=jnp.float32)
             + hb_ref[0:1, :])
        h = jnp.maximum(h, 0.0)
        # Dropout(p=0.2): identity in eval mode.

        # --- remaining hidden layers -----------------------------------------
        for li, w_ref in enumerate(hidden_w_refs, start=1):
            h = (jnp.dot(h.astype(compute_dtype), w_ref[...],
                         preferred_element_type=jnp.float32)
                 + hb_ref[li:li + 1, :])
            h = jnp.maximum(h, 0.0)

        # --- output layer + softmax -------------------------------------------
        # Padded output lanes have zero weight columns and a -1e9 bias, so
        # exp(logit - max) == 0 there and the softmax denominator is exact.
        logits = (jnp.dot(h.astype(compute_dtype), w_out_ref[...],
                          preferred_element_type=jnp.float32)
                  + tail_ref[0:1, :])
        m = jnp.max(logits, axis=1, keepdims=True)
        e = jnp.exp(logits - m)
        denom = jnp.sum(e, axis=1, keepdims=True)
        probs = e * pl.reciprocal(denom, approx=True)   # EUP vrcp (free slot)

        out_ref[...] = (probs * tail_ref[1:2, :] + tail_ref[2:3, :]).astype(out_ref.dtype)

    return kernel


def prepare_actor_params(params, action_bounds, offset, n_layers,
                         *, param_dtype=jnp.bfloat16):
    """One-time preprocessing (call once, reuse across forward calls).

    params = [(W_0, b_0), ..., (W_{n-1}, b_{n-1}), (W_out, b_out)],
    weights stored (in_features, out_features).
    Returns (prepared_pytree, action_dim).
    """
    assert n_layers >= 1
    f32 = jnp.float32
    w_out, b_out = params[-1]
    action_dim = w_out.shape[1]
    out_pad = _round_up(max(action_dim, 128), 128)        # lane-dense output

    # Layer-0 weight stays unsplit; concat is done in-kernel via scratch.
    w0 = params[0][0].astype(param_dtype)                 # (2*state_dim, layer_dim)

    # Hidden biases packed into one f32 array (one DMA, no bf16 cast).
    hidden_b = jnp.concatenate(
        [jnp.reshape(b, (1, -1)).astype(f32) for (_, b) in params[:n_layers]],
        axis=0)                                           # (n_layers, layer_dim)

    hidden_ws = tuple(w.astype(param_dtype) for (w, _) in params[1:n_layers])

    # Output layer: zero-padded weight columns; -1e9 bias on padded lanes.
    pad_cols = out_pad - action_dim
    w_out_p = jnp.pad(w_out.astype(f32), ((0, 0), (0, pad_cols))).astype(param_dtype)
    b_out_p = jnp.pad(jnp.reshape(b_out, (1, -1)).astype(f32),
                      ((0, 0), (0, pad_cols)), constant_values=-1e9)
    bounds_p = jnp.pad(jnp.reshape(action_bounds, (1, -1)).astype(f32),
                       ((0, 0), (0, pad_cols)))
    offset_p = jnp.pad(jnp.reshape(offset, (1, -1)).astype(f32),
                       ((0, 0), (0, pad_cols)))
    tail = jnp.concatenate([b_out_p, bounds_p, offset_p], axis=0)   # (3, out_pad) f32

    prepared = (w0, hidden_b, hidden_ws, w_out_p, tail)
    return prepared, action_dim


@functools.partial(jax.jit, static_argnames=("action_dim", "batch_tile"))
def actor_forward(state, goal, prepared, action_dim, batch_tile=256):
    """Jitted forward; `prepared` comes from prepare_actor_params."""
    w0, hidden_b, hidden_ws, w_out, tail = prepared
    n_layers = len(hidden_ws) + 1
    compute_dtype = w0.dtype
    B, state_dim = state.shape
    out_pad = tail.shape[1]

    # Tile selection: small batches -> single grid step (round to 16 rows for
    # bf16 sublane packing); big batches -> 256-row tiles (MXU fill on
    # v6e/v7x) and a >=2-step parallel grid so both v7x TCs get work.
    b16 = _round_up(B, 16)
    if b16 <= batch_tile:
        tb = b_pad = b16
    else:
        tb = batch_tile
        b_pad = _round_up(B, tb)

    def pad_rows(a):
        return jnp.pad(a, ((0, b_pad - a.shape[0]), (0, 0))).astype(compute_dtype)

    state_p = pad_rows(state)
    goal_p = pad_rows(goal)

    inputs = [state_p, goal_p, w0, hidden_b, *hidden_ws, w_out, tail]

    # Weights / biases / tail stay VMEM-resident across grid steps.
    def const_spec(a):
        return pl.BlockSpec(a.shape, lambda i: (0, 0))

    in_specs = ([pl.BlockSpec((tb, state_dim), lambda i: (i, 0)),
                 pl.BlockSpec((tb, state_dim), lambda i: (i, 0))]
                + [const_spec(a) for a in inputs[2:]])
    out_spec = pl.BlockSpec((tb, out_pad), lambda i: (i, 0))

    # VMEM budget from actual bytes (residents may be double-buffered by the
    # pipeliner, batch tiles are double-buffered, plus the concat scratch),
    # with headroom; capped at v7x's 64 MiB per-TC VMEM.
    # Note: if layer_dim ever grows large, mark const specs Buffered(1) or
    # tile the hidden N dimension instead of keeping everything resident.
    itemsize = jnp.dtype(compute_dtype).itemsize
    resident = sum(int(a.size) * a.dtype.itemsize for a in inputs[2:])
    tile_bytes = 2 * (2 * tb * state_dim * itemsize) + 2 * tb * out_pad * 4
    scratch_bytes = tb * 2 * state_dim * itemsize
    vmem_limit = int(min(64 << 20,
                         max(8 << 20, 3 * (2 * resident + tile_bytes + scratch_bytes))))

    out = pl.pallas_call(
        _make_actor_kernel(n_layers, state_dim, compute_dtype),
        out_shape=jax.ShapeDtypeStruct((b_pad, out_pad), jnp.float32),
        grid=(b_pad // tb,),
        in_specs=in_specs,
        out_specs=out_spec,
        scratch_shapes=[pltpu.VMEM((tb, 2 * state_dim), compute_dtype)],
        compiler_params=pltpu.CompilerParams(
            dimension_semantics=("parallel",),
            vmem_limit_bytes=vmem_limit),
    )(*inputs)

    return out[:B, :action_dim]


def init_params(key, state_dim, action_dim, layer_dim, n_layers):
    """Deterministic synthetic parameters (no checkpoint loading)."""
    params = []
    in_features = state_dim + state_dim
    for _ in range(n_layers):
        key, kw, kb = jax.random.split(key, 3)
        bound = 1.0 / jnp.sqrt(in_features)
        w = jax.random.uniform(kw, (in_features, layer_dim), jnp.float32, -bound, bound)
        b = jax.random.uniform(kb, (1, layer_dim), jnp.float32, -bound, bound)
        params.append((w, b))
        in_features = layer_dim
    key, kw, kb = jax.random.split(key, 3)
    bound = 1.0 / jnp.sqrt(in_features)
    w = jax.random.uniform(kw, (in_features, action_dim), jnp.float32, -bound, bound)
    b = jax.random.uniform(kb, (1, action_dim), jnp.float32, -bound, bound)
    params.append((w, b))
    return params


def reference_forward(state, goal, params, action_bounds, offset, n_layers):
    """Pure-JAX f32 reference for correctness checking."""
    x = jnp.concatenate([state, goal], axis=1)
    for w, b in params[:n_layers]:
        x = jnp.maximum(x @ w + jnp.reshape(b, (1, -1)), 0.0)
    w, b = params[-1]
    logits = x @ w + jnp.reshape(b, (1, -1))
    probs = jax.nn.softmax(logits, axis=1)
    return probs * jnp.reshape(action_bounds, (1, -1)) + jnp.reshape(offset, (1, -1))


if __name__ == "__main__":
    # Small but MXU-representative shapes; batch=200 exercises the small-batch
    # single-step path (rounded to 208 rows / grid=(1,)).
    batch = 200
    state_dim = 64       # concat input dim = 128 (MXU-aligned)
    action_dim = 8
    layer_dim = 128
    n_layers = 2

    key = jax.random.PRNGKey(0)
    key, ks, kg, kp = jax.random.split(key, 4)

    state = jax.random.normal(ks, (batch, state_dim), jnp.float32)
    goal = jax.random.normal(kg, (batch, state_dim), jnp.float32)

    params = init_params(kp, state_dim, action_dim, layer_dim, n_layers)

    # action_bounds / offset broadcast over the batch dimension.
    action_bounds = jnp.full((1, action_dim), 2.0, jnp.float32)
    offset = jnp.full((1, action_dim), -1.0, jnp.float32)

    # One-time preprocessing (cached), then jitted per-call forward.
    prepared, adim = prepare_actor_params(params, action_bounds, offset, n_layers)
    prepared = jax.block_until_ready(prepared)

    out = actor_forward(state, goal, prepared, action_dim=adim)
    out = jax.block_until_ready(out)
    # Second call reuses the compiled kernel + cached prepared params.
    out = jax.block_until_ready(actor_forward(state, goal, prepared, action_dim=adim))

    ref = reference_forward(state, goal, params, action_bounds, offset, n_layers)
    assert out.shape == (batch, action_dim)
    assert bool(jnp.all(jnp.isfinite(out)))
    # bf16 weights + approx reciprocal -> relaxed tolerance vs f32 reference.
    err = float(jnp.max(jnp.abs(out - ref)))
    assert jnp.allclose(out, ref, atol=3e-2, rtol=3e-2), f"max abs err {err}"

    print("KERNEL_OK")
</pallas_src>

<mosaic_0001>
module attributes {stable_mosaic.version = 11 : i64} {
  func.func @kernel(%arg0: i32, %arg1: memref<208x64xbf16, #tpu.memory_space<vmem>>, %arg2: memref<208x64xbf16, #tpu.memory_space<vmem>>, %arg3: memref<128x128xbf16, #tpu.memory_space<vmem>>, %arg4: memref<2x128xf32, #tpu.memory_space<vmem>>, %arg5: memref<128x128xbf16, #tpu.memory_space<vmem>>, %arg6: memref<128x128xbf16, #tpu.memory_space<vmem>>, %arg7: memref<3x128xf32, #tpu.memory_space<vmem>>, %arg8: memref<208x128xf32, #tpu.memory_space<vmem>>, %arg9: memref<208x128xbf16, #tpu.memory_space<vmem>>) attributes {dimension_semantics = [#tpu.dimension_semantics<parallel>], iteration_bounds = array<i64: 1>, scalar_prefetch = 0 : i64, scratch_operands = 1 : i64, tpu.core_type = #tpu.core_type<tc>, window_params = [{transform_indices = @transform_0, window_bounds = array<i64: 208, 64>}, {transform_indices = @transform_1, window_bounds = array<i64: 208, 64>}, {pipeline_mode = #tpu.pipeline_mode<synchronous>, transform_indices = @transform_2, window_bounds = array<i64: 128, 128>}, {pipeline_mode = #tpu.pipeline_mode<synchronous>, transform_indices = @transform_3, window_bounds = array<i64: 2, 128>}, {pipeline_mode = #tpu.pipeline_mode<synchronous>, transform_indices = @transform_4, window_bounds = array<i64: 128, 128>}, {pipeline_mode = #tpu.pipeline_mode<synchronous>, transform_indices = @transform_5, window_bounds = array<i64: 128, 128>}, {pipeline_mode = #tpu.pipeline_mode<synchronous>, transform_indices = @transform_6, window_bounds = array<i64: 3, 128>}, {transform_indices = @transform_7, window_bounds = array<i64: 208, 128>}]} {
    %c0 = arith.constant 0 : index
    %c0_0 = arith.constant 0 : index
    %0 = vector.load %arg1[%c0, %c0_0] : memref<208x64xbf16, #tpu.memory_space<vmem>>, vector<208x64xbf16>
    %c0_1 = arith.constant 0 : index
    %c0_2 = arith.constant 0 : index
    %1 = vector.load %arg9[%c0_1, %c0_2] : memref<208x128xbf16, #tpu.memory_space<vmem>>, vector<208x64xbf16>
    tpu.vector_store %arg9[%c0_1, %c0_2], %0 {strides = array<i32>} : memref<208x128xbf16, #tpu.memory_space<vmem>>, vector<208x64xbf16>,
    %c0_3 = arith.constant 0 : index
    %c0_4 = arith.constant 0 : index
    %2 = vector.load %arg2[%c0_3, %c0_4] : memref<208x64xbf16, #tpu.memory_space<vmem>>, vector<208x64xbf16>
    %c0_5 = arith.constant 0 : index
    %c64 = arith.constant 64 : index
    %3 = vector.load %arg9[%c0_5, %c64] : memref<208x128xbf16, #tpu.memory_space<vmem>>, vector<208x64xbf16>
    tpu.vector_store %arg9[%c0_5, %c64], %2 {strides = array<i32>} : memref<208x128xbf16, #tpu.memory_space<vmem>>, vector<208x64xbf16>,
    %c0_6 = arith.constant 0 : index
    %c0_7 = arith.constant 0 : index
    %4 = vector.load %arg9[%c0_6, %c0_7] : memref<208x128xbf16, #tpu.memory_space<vmem>>, vector<208x128xbf16>
    %c0_8 = arith.constant 0 : index
    %c0_9 = arith.constant 0 : index
    %5 = vector.load %arg3[%c0_8, %c0_9] : memref<128x128xbf16, #tpu.memory_space<vmem>>, vector<128x128xbf16>
    %cst = arith.constant dense<0.000000e+00> : vector<208x128xf32>
    %6 = tpu.matmul %4, %5, %cst {dimension_numbers = #tpu.dot_dimension_numbers<[1], [0], [0], [1], [0, 0, 1, 1], [], []>} : vector<208x128xbf16>, vector<128x128xbf16>, vector<208x128xf32> -> vector<208x128xf32>
    %c0_10 = arith.constant 0 : index
    %c0_11 = arith.constant 0 : index
    %7 = vector.load %arg4[%c0_10, %c0_11] : memref<2x128xf32, #tpu.memory_space<vmem>>, vector<1x128xf32>
    %8 = vector.broadcast %7 : vector<1x128xf32> to vector<208x128xf32>
    %9 = arith.addf %6, %8 : vector<208x128xf32>
    %cst_12 = arith.constant 0.000000e+00 : f32
    %10 = vector.broadcast %cst_12 : f32 to vector<208x128xf32>
    %11 = arith.maximumf %9, %10 : vector<208x128xf32>
    %12 = arith.truncf %11 : vector<208x128xf32> to vector<208x128xbf16>
    %c0_13 = arith.constant 0 : index
    %c0_14 = arith.constant 0 : index
    %13 = vector.load %arg5[%c0_13, %c0_14] : memref<128x128xbf16, #tpu.memory_space<vmem>>, vector<128x128xbf16>
    %cst_15 = arith.constant dense<0.000000e+00> : vector<208x128xf32>
    %14 = tpu.matmul %12, %13, %cst_15 {dimension_numbers = #tpu.dot_dimension_numbers<[1], [0], [0], [1], [0, 0, 1, 1], [], []>} : vector<208x128xbf16>, vector<128x128xbf16>, vector<208x128xf32> -> vector<208x128xf32>
    %c1 = arith.constant 1 : index
    %c0_16 = arith.constant 0 : index
    %15 = vector.load %arg4[%c1, %c0_16] : memref<2x128xf32, #tpu.memory_space<vmem>>, vector<1x128xf32>
    %16 = vector.broadcast %15 : vector<1x128xf32> to vector<208x128xf32>
    %17 = arith.addf %14, %16 : vector<208x128xf32>
    %cst_17 = arith.constant 0.000000e+00 : f32
    %18 = vector.broadcast %cst_17 : f32 to vector<208x128xf32>
    %19 = arith.maximumf %17, %18 : vector<208x128xf32>
    %20 = arith.truncf %19 : vector<208x128xf32> to vector<208x128xbf16>
    %c0_18 = arith.constant 0 : index
    %c0_19 = arith.constant 0 : index
    %21 = vector.load %arg6[%c0_18, %c0_19] : memref<128x128xbf16, #tpu.memory_space<vmem>>, vector<128x128xbf16>
    %cst_20 = arith.constant dense<0.000000e+00> : vector<208x128xf32>
    %22 = tpu.matmul %20, %21, %cst_20 {dimension_numbers = #tpu.dot_dimension_numbers<[1], [0], [0], [1], [0, 0, 1, 1], [], []>} : vector<208x128xbf16>, vector<128x128xbf16>, vector<208x128xf32> -> vector<208x128xf32>
    %c0_21 = arith.constant 0 : index
    %c0_22 = arith.constant 0 : index
    %23 = vector.load %arg7[%c0_21, %c0_22] : memref<3x128xf32, #tpu.memory_space<vmem>>, vector<1x128xf32>
    %24 = vector.broadcast %23 : vector<1x128xf32> to vector<208x128xf32>
    %25 = arith.addf %22, %24 : vector<208x128xf32>
    %cst_23 = arith.constant dense<0xFF800000> : vector<208xf32>
    %26 = vector.multi_reduction <maximumf>, %25, %cst_23 [1] : vector<208x128xf32> to vector<208xf32>
    %27 = vector.shape_cast %26 : vector<208xf32> to vector<208x1xf32>
    %28 = vector.broadcast %27 : vector<208x1xf32> to vector<208x128xf32>
    %29 = arith.subf %25, %28 : vector<208x128xf32>
    %30 = math.exp %29 : vector<208x128xf32>
    %cst_24 = arith.constant dense<0.000000e+00> : vector<208xf32>
    %31 = vector.multi_reduction <add>, %30, %cst_24 [1] : vector<208x128xf32> to vector<208xf32>
    %32 = vector.shape_cast %31 : vector<208xf32> to vector<208x1xf32>
    %33 = tpu.reciprocal %32 {approx = true} : vector<208x1xf32> -> vector<208x1xf32>
    %34 = vector.broadcast %33 : vector<208x1xf32> to vector<208x128xf32>
    %35 = arith.mulf %30, %34 : vector<208x128xf32>
    %c1_25 = arith.constant 1 : index
    %c0_26 = arith.constant 0 : index
    %36 = vector.load %arg7[%c1_25, %c0_26] : memref<3x128xf32, #tpu.memory_space<vmem>>, vector<1x128xf32>
    %37 = vector.broadcast %36 : vector<1x128xf32> to vector<208x128xf32>
    %38 = arith.mulf %35, %37 : vector<208x128xf32>
    %c2 = arith.constant 2 : index
    %c0_27 = arith.constant 0 : index
    %39 = vector.load %arg7[%c2, %c0_27] : memref<3x128xf32, #tpu.memory_space<vmem>>, vector<1x128xf32>
    %40 = vector.broadcast %39 : vector<1x128xf32> to vector<208x128xf32>
    %41 = arith.addf %38, %40 : vector<208x128xf32>
    %c0_28 = arith.constant 0 : index
    %c0_29 = arith.constant 0 : index
    %42 = vector.load %arg8[%c0_28, %c0_29] : memref<208x128xf32, #tpu.memory_space<vmem>>, vector<208x128xf32>
    tpu.vector_store %arg8[%c0_28, %c0_29], %41 {strides = array<i32>} : memref<208x128xf32, #tpu.memory_space<vmem>>, vector<208x128xf32>,
    return
  }
  func.func @transform_0(%arg0: i32) -> (i32, i32) {
    %c0_i32 = arith.constant 0 : i32
    %c0_i32_0 = arith.constant 0 : i32
    return %arg0, %c0_i32 : i32, i32
  }
  func.func @transform_1(%arg0: i32) -> (i32, i32) {
    %c0_i32 = arith.constant 0 : i32
    %c0_i32_0 = arith.constant 0 : i32
    return %arg0, %c0_i32 : i32, i32
  }
  func.func @transform_2(%arg0: i32) -> (i32, i32) {
    %c0_i32 = arith.constant 0 : i32
    %c0_i32_0 = arith.constant 0 : i32
    %c0_i32_1 = arith.constant 0 : i32
    return %c0_i32, %c0_i32_0 : i32, i32
  }
  func.func @transform_3(%arg0: i32) -> (i32, i32) {
    %c0_i32 = arith.constant 0 : i32
    %c0_i32_0 = arith.constant 0 : i32
    %c0_i32_1 = arith.constant 0 : i32
    return %c0_i32, %c0_i32_0 : i32, i32
  }
  func.func @transform_4(%arg0: i32) -> (i32, i32) {
    %c0_i32 = arith.constant 0 : i32
    %c0_i32_0 = arith.constant 0 : i32
    %c0_i32_1 = arith.constant 0 : i32
    return %c0_i32, %c0_i32_0 : i32, i32
  }
  func.func @transform_5(%arg0: i32) -> (i32, i32) {
    %c0_i32 = arith.constant 0 : i32
    %c0_i32_0 = arith.constant 0 : i32
    %c0_i32_1 = arith.constant 0 : i32
    return %c0_i32, %c0_i32_0 : i32, i32
  }
  func.func @transform_6(%arg0: i32) -> (i32, i32) {
    %c0_i32 = arith.constant 0 : i32
    %c0_i32_0 = arith.constant 0 : i32
    %c0_i32_1 = arith.constant 0 : i32
    return %c0_i32, %c0_i32_0 : i32, i32
  }
  func.func @transform_7(%arg0: i32) -> (i32, i32) {
    %c0_i32 = arith.constant 0 : i32
    %c0_i32_0 = arith.constant 0 : i32
    return %arg0, %c0_i32 : i32, i32
  }
}

</mosaic_0001>

<bundles_post_ra>
// kernel: actor_forward.1
= control target key start
LH: loop header
LB: loop body
LE: loop exit
PB: predicated region body
PF: predicated region fallthrough
CT: control target
= control target key end

     0   :  { %s1477_s28 = smov 64   ;;  %vm52_vm0 = vcmask 519168   ;;  %vm209_vm1 = vcmask 1043968   ;;  %s2274_s1 = inlined_call_operand.vmem [shape: bf16[208,64], index: 1, kind: input, shape index: {}]   ;;  %s2275_s2 = inlined_call_operand.vmem [shape: bf16[128,128], index: 2, kind: input, shape index: {}]   ;;  %s2276_s0 = inlined_call_operand.vmem [shape: bf16[208,64], index: 0, kind: input, shape index: {}]   ;;  %s2277_s3 = inlined_call_operand.vmem [shape: f32[2,128], index: 3, kind: input, shape index: {}]   ;;  %s2278_s4 = inlined_call_operand.vmem [shape: bf16[128,128], index: 4, kind: input, shape index: {}]   ;;  %s2279_s5 = inlined_call_operand.vmem [shape: bf16[128,128], index: 5, kind: input, shape index: {}]   ;;  %s2280_s6 = inlined_call_operand.vmem [shape: f32[3,128], index: 6, kind: input, shape index: {}]   ;;  %s2281_s7 = inlined_call_operand.vmem [shape: f32[208,128], index: 7, kind: output, shape index: {}]  }
   0x1   :  { %v79_v0 = vld [vmem:[%s2274_s1] sm:$0xf]  ;;  %v81_v1 = vld [vmem:[%s2274_s1 + $0x8] sm:$0xf]  ;;  %v83_v2 = vld [vmem:[%s2274_s1 + $0x10] sm:$0xf] }
   0x2   :  { %131 = vrot.lane.b32.xlu0 %v79_v0, %s1477_s28  ;;  %135 = vrot.lane.b32.xlu1 %v81_v1, %s1477_s28  ;;  %v80_v3 = vld [vmem:[%s2274_s1 + $0x4] sm:$0xf]  ;;  %v82_v4 = vld [vmem:[%s2274_s1 + $0xc] sm:$0xf] }
   0x3   :  { %139 = vrot.lane.b32.xlu2 %v83_v2, %s1477_s28  ;;  %v84_v5 = vld [vmem:[%s2274_s1 + $0x14] sm:$0xf]  ;;  %v85_v6 = vld [vmem:[%s2274_s1 + $0x18] sm:$0xf]  ;;  %v86_v7 = vld [vmem:[%s2274_s1 + $0x1c] sm:$0xf] }
   0x4   :  { %v87_v8 = vld [vmem:[%s2274_s1 + $0x20] sm:$0xf]  ;;  %v88_v9 = vld [vmem:[%s2274_s1 + $0x24] sm:$0xf]  ;;  %v89_v10 = vld [vmem:[%s2274_s1 + $0x28] sm:$0xf] }
   0x5   :  { %v90_v11 = vld [vmem:[%s2274_s1 + $0x2c] sm:$0xf]  ;;  %v1326_v12 = vld [vmem:[%s2275_s2 + $0x38] sm:$0xff]  ;;  %v91_v13 = vld [vmem:[%s2274_s1 + $0x30] sm:$0xf] }
   0x6   :  { %406 = vmatpush.bf16.msra.mxu0 %v1326_v12  ;;  %1343 = vmatpush.bf16.msra.mxu3 %v1326_v12  ;;  %v92_v14 = vld [vmem:[%s2274_s1 + $0x34] sm:$0xf]  ;;  %v99_v16 = vld [vmem:[%s2274_s1 + $0x50] sm:$0xf]  ;;  %v1324_v17 = vld [vmem:[%s2275_s2 + $0x28] sm:$0xff] }
   0x7   :  { %v1325_v15 = vld [vmem:[%s2275_s2 + $0x30] sm:$0xff]  ;;  %v93_v19 = vld [vmem:[%s2274_s1 + $0x38] sm:$0xf]  ;;  %v1323_v20 = vld [vmem:[%s2275_s2 + $0x20] sm:$0xff] }
   0x8   :  { %v100_v18 = vld [vmem:[%s2274_s1 + $0x54] sm:$0xf]  ;;  %v94_v21 = vld [vmem:[%s2274_s1 + $0x3c] sm:$0xf]  ;;  %v101_v23 = vld [vmem:[%s2274_s1 + $0x58] sm:$0xf] }
   0x9   :  { %v102_v22 = vld [vmem:[%s2274_s1 + $0x5c] sm:$0xf]  ;;  %v95_v24 = vld [vmem:[%s2274_s1 + $0x40] sm:$0xf]  ;;  %v96_v26 = vld [vmem:[%s2274_s1 + $0x44] sm:$0xf] }
   0xa   :  { %133 = vrot.lane.b32.xlu0 %v80_v3, %s1477_s28  ;;  %137 = vrot.lane.b32.xlu1 %v82_v4, %s1477_s28  ;;  %v103_v25 = vld [vmem:[%s2274_s1 + $0x60] sm:$0xf]  ;;  %v104_v27 = vld [vmem:[%s2274_s1 + $0x64] sm:$0xf] }
   0xb   :  { %141 = vrot.lane.b32.xlu2 %v84_v5, %s1477_s28  ;;  %407 = vmatpush.bf16.msra.mxu0 %v1325_v15  ;;  %v26_v28 = vld [vmem:[%s2276_s0] sm:$0xf]  ;;  %v1322_v29 = vld [vmem:[%s2275_s2 + $0x18] sm:$0xff]  ;;  %v30_v30 = vld [vmem:[%s2276_s0 + $0x10] sm:$0xf] }
   0xc   :  { %1344 = vmatpush.bf16.msra.mxu3 %v1325_v15  ;;  %53 = vst.msk [vmem:[#allocation2] sm:$0xf] %vm52_vm0, %v26_v28  ;;  %v28_v31 = vld [vmem:[%s2276_s0 + $0x8] sm:$0xf]  ;;  %v1321_v32 = vld [vmem:[%s2275_s2 + $0x10] sm:$0xff]  ;;  %v1319_v38 = vld [vmem:[%s2275_s2] sm:$0xff] }
   0xd   :  { %57 = vst.msk [vmem:[#allocation2 + $0x10] sm:$0xf] %vm52_vm0, %v30_v30  ;;  %v27_v33 = vld [vmem:[%s2276_s0 + $0x4] sm:$0xf]  ;;  %v1320_v34 = vld [vmem:[%s2275_s2 + $0x8] sm:$0xff]  ;;  %v1333_v28 = vld [vmem:[%s2278_s4 + $0x30] sm:$0xff] }
   0xe   :  { %55 = vst.msk [vmem:[#allocation2 + $0x8] sm:$0xf] %vm52_vm0, %v28_v31  ;;  %v31_v35 = vld [vmem:[%s2276_s0 + $0x14] sm:$0xf]  ;;  %v29_v37 = vld [vmem:[%s2276_s0 + $0xc] sm:$0xf] }
   0xf   :  { %408 = vmatpush.bf16.msra.mxu0 %v1324_v17  ;;  %54 = vst.msk [vmem:[#allocation2 + $0x4] sm:$0xf] %vm52_vm0, %v27_v33  ;;  %v32_v39 = vld [vmem:[%s2276_s0 + $0x18] sm:$0xf]  ;;  %v34_v41 = vld [vmem:[%s2276_s0 + $0x20] sm:$0xf] }
  0x10   :  { %1345 = vmatpush.bf16.msra.mxu3 %v1324_v17  ;;  %58 = vst.msk [vmem:[#allocation2 + $0x14] sm:$0xf] %vm52_vm0, %v31_v35  ;;  %v33_v42 = vld [vmem:[%s2276_s0 + $0x1c] sm:$0xf]  ;;  %v35_v43 = vld [vmem:[%s2276_s0 + $0x24] sm:$0xf] }
  0x11   :  { %56 = vst.msk [vmem:[#allocation2 + $0xc] sm:$0xf] %vm52_vm0, %v29_v37  ;;  %v37_v44 = vld [vmem:[%s2276_s0 + $0x2c] sm:$0xf]  ;;  %v36_v45 = vld [vmem:[%s2276_s0 + $0x28] sm:$0xf] }
  0x12   :  { %143 = vrot.lane.b32.xlu0 %v85_v6, %s1477_s28  ;;  %145 = vrot.lane.b32.xlu1 %v86_v7, %s1477_s28  ;;  %59 = vst.msk [vmem:[#allocation2 + $0x18] sm:$0xf] %vm52_vm0, %v32_v39  ;;  %v38_v49 = vld [vmem:[%s2276_s0 + $0x30] sm:$0xf]  ;;  %v98_v51 = vld [vmem:[%s2274_s1 + $0x4c] sm:$0xf] }
  0x13   :  { %147 = vrot.lane.b32.xlu2 %v87_v8, %s1477_s28  ;;  %409 = vmatpush.bf16.msra.mxu0 %v1323_v20  ;;  %61 = vst.msk [vmem:[#allocation2 + $0x20] sm:$0xf] %vm52_vm0, %v34_v41  ;;  %v97_v52 = vld [vmem:[%s2274_s1 + $0x48] sm:$0xf]  ;;  %v46_v53 = vld [vmem:[%s2276_s0 + $0x50] sm:$0xf] }
  0x14   :  { %1346 = vmatpush.bf16.msra.mxu3 %v1323_v20  ;;  %60 = vst.msk [vmem:[#allocation2 + $0x1c] sm:$0xf] %vm52_vm0, %v33_v42  ;;  %v39_v54 = vld [vmem:[%s2276_s0 + $0x34] sm:$0xf]  ;;  %v40_v58 = vld [vmem:[%s2276_s0 + $0x38] sm:$0xf] }
  0x15   :  { %62 = vst.msk [vmem:[#allocation2 + $0x24] sm:$0xf] %vm52_vm0, %v35_v43  ;;  %v47_v55 = vld [vmem:[%s2276_s0 + $0x54] sm:$0xf]  ;;  %v41_v0 = vld [vmem:[%s2276_s0 + $0x3c] sm:$0xf] }
  0x16   :  { %64 = vst.msk [vmem:[#allocation2 + $0x2c] sm:$0xf] %vm52_vm0, %v37_v44  ;;  %v49_v1 = vld [vmem:[%s2276_s0 + $0x5c] sm:$0xf]  ;;  %v48_v2 = vld [vmem:[%s2276_s0 + $0x58] sm:$0xf] }
  0x17   :  { %410 = vmatpush.bf16.msra.mxu0 %v1322_v29  ;;  %63 = vst.msk [vmem:[#allocation2 + $0x28] sm:$0xf] %vm52_vm0, %v36_v45  ;;  %v42_v3 = vld [vmem:[%s2276_s0 + $0x40] sm:$0xf]  ;;  %v1330_v31 = vld [vmem:[%s2278_s4 + $0x18] sm:$0xff]  ;;  %v1329_v33 = vld [vmem:[%s2278_s4 + $0x10] sm:$0xff] }
  0x18   :  { %1347 = vmatpush.bf16.msra.mxu3 %v1322_v29  ;;  %65 = vst.msk [vmem:[#allocation2 + $0x30] sm:$0xf] %vm52_vm0, %v38_v49  ;;  %v50_v12 = vld [vmem:[%s2276_s0 + $0x60] sm:$0xf]  ;;  %v1332_v29 = vld [vmem:[%s2278_s4 + $0x28] sm:$0xff] }
  0x19   :  { %73 = vst.msk [vmem:[#allocation2 + $0x50] sm:$0xf] %vm52_vm0, %v46_v53  ;;  %v1331_v30 = vld [vmem:[%s2278_s4 + $0x20] sm:$0xff]  ;;  %v44_v35 = vld [vmem:[%s2276_s0 + $0x48] sm:$0xf] }
  0x1a   :  { %149 = vrot.lane.b32.xlu0 %v88_v9, %s1477_s28  ;;  %151 = vrot.lane.b32.xlu1 %v89_v10, %s1477_s28  ;;  %66 = vst.msk [vmem:[#allocation2 + $0x34] sm:$0xf] %vm52_vm0, %v39_v54  ;;  %v1327_v39 = vld [vmem:[%s2278_s4] sm:$0xff] }
  0x1b   :  { %153 = vrot.lane.b32.xlu2 %v90_v11, %s1477_s28  ;;  %411 = vmatpush.bf16.msra.mxu0 %v1321_v32  ;;  %74 = vst.msk [vmem:[#allocation2 + $0x54] sm:$0xf] %vm52_vm0, %v47_v55  ;;  %v51_v11 = vld [vmem:[%s2276_s0 + $0x64] sm:$0xf]  ;;  %v1803_v43 = vld [vmem:[%s2277_s3] ss:$0 sm:$0xff] }
  0x1c   :  { %1348 = vmatpush.bf16.msra.mxu3 %v1321_v32  ;;  %67 = vst.msk [vmem:[#allocation2 + $0x38] sm:$0xf] %vm52_vm0, %v40_v58 }
  0x1d   :  { %68 = vst.msk [vmem:[#allocation2 + $0x3c] sm:$0xf] %vm52_vm0, %v41_v0 }
  0x1e   :  { %76 = vst.msk [vmem:[#allocation2 + $0x5c] sm:$0xf] %vm52_vm0, %v49_v1 }
  0x1f   :  { %412 = vmatpush.bf16.msra.mxu0 %v1320_v34  ;;  %75 = vst.msk [vmem:[#allocation2 + $0x58] sm:$0xf] %vm52_vm0, %v48_v2 }
  0x20   :  { %1349 = vmatpush.bf16.msra.mxu3 %v1320_v34  ;;  %69 = vst.msk [vmem:[#allocation2 + $0x40] sm:$0xf] %vm52_vm0, %v42_v3  ;;  %v45_v34 = vld [vmem:[%s2276_s0 + $0x4c] sm:$0xf] }
  0x21   :  { %78 = vst.msk [vmem:[#allocation2 + $0x64] sm:$0xf] %vm52_vm0, %v51_v11 }
  0x22   :  { %155 = vrot.lane.b32.xlu0 %v91_v13, %s1477_s28  ;;  %157 = vrot.lane.b32.xlu1 %v92_v14, %s1477_s28  ;;  %77 = vst.msk [vmem:[#allocation2 + $0x60] sm:$0xf] %vm52_vm0, %v50_v12 }
  0x23   :  { %171 = vrot.lane.b32.xlu2 %v99_v16, %s1477_s28  ;;  %413 = vmatpush.bf16.msra.mxu0 %v1319_v38  ;;  %72 = vst.msk [vmem:[#allocation2 + $0x4c] sm:$0xf] %vm52_vm0, %v45_v34 }
  0x24   :  { %1350 = vmatpush.bf16.msra.mxu3 %v1319_v38  ;;  %71 = vst.msk [vmem:[#allocation2 + $0x48] sm:$0xf] %vm52_vm0, %v44_v35 }
  0x2a   :  { %173 = vrot.lane.b32.xlu0 %v100_v18, %s1477_s28  ;;  %159 = vrot.lane.b32.xlu1 %v93_v19, %s1477_s28  ;;  %v43_v19 = vld [vmem:[%s2276_s0 + $0x44] sm:$0xf] }
  0x2b   :  { %161 = vrot.lane.b32.xlu2 %v94_v21, %s1477_s28  ;;  %70 = vst.msk [vmem:[#allocation2 + $0x44] sm:$0xf] %vm52_vm0, %v43_v19 }
  0x32   :  { %177 = vrot.lane.b32.xlu1 %v102_v22, %s1477_s28  ;;  %175 = vrot.lane.b32.xlu0 %v101_v23, %s1477_s28 }
  0x33   :  { %163 = vrot.lane.b32.xlu2 %v95_v24, %s1477_s28 }
  0x3a   :  { %179 = vrot.lane.b32.xlu1 %v103_v25, %s1477_s28  ;;  %165 = vrot.lane.b32.xlu0 %v96_v26, %s1477_s28  ;;  %v1334_v26 = vld [vmem:[%s2278_s4 + $0x38] sm:$0xff] }
  0x3b   :  { %181 = vrot.lane.b32.xlu2 %v104_v27, %s1477_s28  ;;  %585 = vmatpush.bf16.msra.mxu1 %v1334_v26 }
  0x3c   :  { %1351 = vmatpush.bf16.msrb.mxu3 %v1334_v26 }
  0x3f   :  { %586 = vmatpush.bf16.msra.mxu1 %v1333_v28 }
  0x40   :  { %1352 = vmatpush.bf16.msrb.mxu3 %v1333_v28 }
  0x42   :  { %169 = vrot.lane.b32.xlu1 %v98_v51, %s1477_s28  ;;  %167 = vrot.lane.b32.xlu0 %v97_v52, %s1477_s28 }
  0x43   :  { %587 = vmatpush.bf16.msra.mxu1 %v1332_v29 }
  0x44   :  { %1353 = vmatpush.bf16.msrb.mxu3 %v1332_v29 }
  0x47   :  { %588 = vmatpush.bf16.msra.mxu1 %v1331_v30 }
  0x48   :  { %1354 = vmatpush.bf16.msrb.mxu3 %v1331_v30 }
  0x4b   :  { %589 = vmatpush.bf16.msra.mxu1 %v1330_v31 }
  0x4c   :  { %1355 = vmatpush.bf16.msrb.mxu3 %v1330_v31 }
  0x4f   :  { %590 = vmatpush.bf16.msra.mxu1 %v1329_v33 }
  0x50   :  { %1356 = vmatpush.bf16.msrb.mxu3 %v1329_v33 }
  0x5d   :  { %v140_v36 = vpop.permute.xlu2 %139 }
  0x5e   :  { %214 = vst.msk [vmem:[#allocation2 + $0x10] sm:$0xf] %vm209_vm1, %v140_v36  ;;  %v1328_v36 = vld [vmem:[%s2278_s4 + $0x8] sm:$0xff] }
  0x5f   :  { %591 = vmatpush.bf16.msra.mxu1 %v1328_v36  ;;  %1357 = vmatpush.bf16.msrb.mxu3 %v1328_v36 }
  0x63   :  { %592 = vmatpush.bf16.msra.mxu1 %v1327_v39  ;;  %1358 = vmatpush.bf16.msrb.mxu3 %v1327_v39 }
  0x65   :  { %v142_v40 = vpop.permute.xlu2 %141 }
  0x66   :  { %215 = vst.msk [vmem:[#allocation2 + $0x14] sm:$0xf] %vm209_vm1, %v142_v40 }
  0x6d   :  { %v148_v46 = vpop.permute.xlu2 %147  ;;  %v1308_v15 = vld [vmem:[#allocation2 + $0x10] sm:$0xff] }
  0x6e   :  { %218 = vst.msk [vmem:[#allocation2 + $0x20] sm:$0xf] %vm209_vm1, %v148_v46 }
  0x74   :  { %v132_v47 = vpop.permute.xlu0 %131  ;;  %v136_v48 = vpop.permute.xlu1 %135 }
  0x75   :  { %210 = vst.msk [vmem:[#allocation2] sm:$0xf] %vm209_vm1, %v132_v47  ;;  %v154_v50 = vpop.permute.xlu2 %153 }
  0x76   :  { %212 = vst.msk [vmem:[#allocation2 + $0x8] sm:$0xf] %vm209_vm1, %v136_v48 }
  0x77   :  { %221 = vst.msk [vmem:[#allocation2 + $0x2c] sm:$0xf] %vm209_vm1, %v154_v50 }
  0x7c   :  { %v134_v56 = vpop.permute.xlu0 %133  ;;  %v138_v57 = vpop.permute.xlu1 %137 }
  0x7d   :  { %211 = vst.msk [vmem:[#allocation2 + $0x4] sm:$0xf] %vm209_vm1, %v134_v56  ;;  %v172_v59 = vpop.permute.xlu2 %171 }
  0x7e   :  { %213 = vst.msk [vmem:[#allocation2 + $0xc] sm:$0xf] %vm209_vm1, %v138_v57 }
  0x7f   :  { %230 = vst.msk [vmem:[#allocation2 + $0x50] sm:$0xf] %vm209_vm1, %v172_v59 }
  0x84   :  { %v144_v60 = vpop.permute.xlu0 %143  ;;  %v1306_v61 = vld [vmem:[#allocation2] sm:$0xff]  ;;  %v146_v62 = vpop.permute.xlu1 %145 }
  0x85   :  { %216 = vst.msk [vmem:[#allocation2 + $0x18] sm:$0xf] %vm209_vm1, %v144_v60  ;;  %414 = vmatmul.bf16.vlgmr.msra.gmra.mxu0 %v1306_v61  ;;  %v162_v63 = vpop.permute.xlu2 %161  ;;  %v1307_v8 = vld [vmem:[#allocation2 + $0x8] sm:$0xff] }
  0x86   :  { %217 = vst.msk [vmem:[#allocation2 + $0x1c] sm:$0xf] %vm209_vm1, %v146_v62 }
  0x87   :  { %225 = vst.msk [vmem:[#allocation2 + $0x3c] sm:$0xf] %vm209_vm1, %v162_v63 }
  0x8c   :  { %v150_v4 = vpop.permute.xlu0 %149  ;;  %v152_v5 = vpop.permute.xlu1 %151 }
  0x8d   :  { %219 = vst.msk [vmem:[#allocation2 + $0x24] sm:$0xf] %vm209_vm1, %v150_v4  ;;  %v164_v6 = vpop.permute.xlu2 %163  ;;  %v1309_v23 = vld [vmem:[#allocation2 + $0x18] sm:$0xff] }
  0x8e   :  { %220 = vst.msk [vmem:[#allocation2 + $0x28] sm:$0xf] %vm209_vm1, %v152_v5 }
  0x8f   :  { %226 = vst.msk [vmem:[#allocation2 + $0x40] sm:$0xf] %vm209_vm1, %v164_v6 }
  0x94   :  { %v156_v7 = vpop.permute.xlu0 %155  ;;  %v158_v9 = vpop.permute.xlu1 %157  ;;  %v1310_v25 = vld [vmem:[#allocation2 + $0x20] sm:$0xff] }
  0x95   :  { %222 = vst.msk [vmem:[#allocation2 + $0x30] sm:$0xf] %vm209_vm1, %v156_v7  ;;  %419 = vmatmul.bf16.gmra.mxu0 %v1307_v8  ;;  %v182_v10 = vpop.permute.xlu2 %181  ;;  %v1311_v27 = vld [vmem:[#allocation2 + $0x28] sm:$0xff] }
  0x96   :  { %223 = vst.msk [vmem:[#allocation2 + $0x34] sm:$0xf] %vm209_vm1, %v158_v9 }
  0x97   :  { %235 = vst.msk [vmem:[#allocation2 + $0x64] sm:$0xf] %vm209_vm1, %v182_v10 }
  0x9c   :  { %v174_v13 = vpop.permute.xlu0 %173  ;;  %v160_v14 = vpop.permute.xlu1 %159 }
  0x9d   :  { %231 = vst.msk [vmem:[#allocation2 + $0x54] sm:$0xf] %vm209_vm1, %v174_v13  ;;  %v1312_v32 = vld [vmem:[#allocation2 + $0x30] sm:$0xff] }
  0x9e   :  { %224 = vst.msk [vmem:[#allocation2 + $0x38] sm:$0xf] %vm209_vm1, %v160_v14 }
  0xa4   :  { %v1316_v16 = vld [vmem:[#allocation2 + $0x50] sm:$0xff]  ;;  %v178_v17 = vpop.permute.xlu1 %177  ;;  %v176_v18 = vpop.permute.xlu0 %175 }
  0xa5   :  { %233 = vst.msk [vmem:[#allocation2 + $0x5c] sm:$0xf] %vm209_vm1, %v178_v17  ;;  %424 = vmatmul.bf16.gmra.mxu0 %v1308_v15  ;;  %464 = vmatmul.bf16.vlgmr.msra.gmra.mxu3 %v1316_v16  ;;  %v1313_v40 = vld [vmem:[#allocation2 + $0x38] sm:$0xff] }
  0xa6   :  { %232 = vst.msk [vmem:[#allocation2 + $0x58] sm:$0xf] %vm209_vm1, %v176_v18 }
  0xac   :  { %v180_v20 = vpop.permute.xlu1 %179  ;;  %v166_v21 = vpop.permute.xlu0 %165 }
  0xad   :  { %234 = vst.msk [vmem:[#allocation2 + $0x60] sm:$0xf] %vm209_vm1, %v180_v20  ;;  %v1317_v22 = vld [vmem:[#allocation2 + $0x58] sm:$0xff] }
  0xae   :  { %227 = vst.msk [vmem:[#allocation2 + $0x44] sm:$0xf] %vm209_vm1, %v166_v21 }
  0xb4   :  { %v1318_v24 = vld [vmem:[#allocation2 + $0x60] sm:$0xff]  ;;  %v170_v37 = vpop.permute.xlu1 %169  ;;  %v168_v38 = vpop.permute.xlu0 %167 }
  0xb5   :  { %429 = vmatmul.bf16.gmra.mxu0 %v1309_v23  ;;  %469 = vmatmul.bf16.gmra.mxu3 %v1317_v22  ;;  %229 = vst.msk [vmem:[#allocation2 + $0x4c] sm:$0xf] %vm209_vm1, %v170_v37  ;;  %v1314_v42 = vld [vmem:[#allocation2 + $0x40] sm:$0xff] }
  0xb6   :  { %228 = vst.msk [vmem:[#allocation2 + $0x48] sm:$0xf] %vm209_vm1, %v168_v38 }
  0xbd   :  { %v1315_v50 = vld [vmem:[#allocation2 + $0x48] sm:$0xff] }
  0xc5   :  { %434 = vmatmul.bf16.gmra.mxu0 %v1310_v25  ;;  %474 = vmatmul.bf16.gmra.mxu3 %v1318_v24 }
  0xd5   :  { %439 = vmatmul.bf16.gmra.mxu0 %v1311_v27 }
  0xe5   :  { %444 = vmatmul.bf16.gmra.mxu0 %v1312_v32 }
  0xf5   :  { %449 = vmatmul.bf16.gmra.mxu0 %v1313_v40  ;;  %v1342_v40 = vld [vmem:[%s2279_s5 + $0x38] sm:$0xff] }
  0xf6   :  { %764 = vmatpush.bf16.msra.mxu2 %v1342_v40  ;;  %1359 = vmatpush.bf16.msra.mxu3 %v1342_v40 }
 0x102   :  { %v415_v41 = vpop.f32.mrf.mxu0 }
 0x103   :  { %v416_v44 = vadd.f32 %v1803_v43, %v415_v41 }
 0x105   :  { %454 = vmatmul.bf16.gmra.mxu0 %v1314_v42  ;;  %v480_v47 = vmax.f32 %v416_v44, 0.0 }
 0x10a   :  { %v417_v45 = vpop.f32.mrf.mxu0 }
 0x10b   :  { %v418_v46 = vadd.f32 %v1803_v43, %v417_v45  ;;  %v1341_v45 = vld [vmem:[%s2279_s5 + $0x30] sm:$0xff] }
 0x10c   :  { %765 = vmatpush.bf16.msra.mxu2 %v1341_v45  ;;  %1360 = vmatpush.bf16.msra.mxu3 %v1341_v45 }
 0x10d   :  { %v481_v48 = vmax.f32 %v418_v46, 0.0 }
 0x10f   :  { %v506_v49 = vpack.c.bf16 %v481_v48, %v480_v47  ;;  %v1340_v47 = vld [vmem:[%s2279_s5 + $0x28] sm:$0xff]  ;;  %v1339_v48 = vld [vmem:[%s2279_s5 + $0x20] sm:$0xff] }
 0x110   :  { %766 = vmatpush.bf16.msra.mxu2 %v1340_v47  ;;  %1361 = vmatpush.bf16.msra.mxu3 %v1340_v47 }
 0x111   :  { %593 = vmatmul.bf16.vlgmr.msra.gmra.mxu1 %v506_v49 }
 0x112   :  { %v420_v51 = vpop.f32.mrf.mxu0 }
 0x113   :  { %v421_v52 = vadd.f32 %v1803_v43, %v420_v51 }
 0x114   :  { %767 = vmatpush.bf16.msra.mxu2 %v1339_v48  ;;  %1362 = vmatpush.bf16.msra.mxu3 %v1339_v48 }
 0x115   :  { %459 = vmatmul.bf16.gmra.mxu0 %v1315_v50  ;;  %v482_v55 = vmax.f32 %v421_v52, 0.0  ;;  %v1338_v52 = vld [vmem:[%s2279_s5 + $0x18] sm:$0xff] }
 0x118   :  { %768 = vmatpush.bf16.msra.mxu2 %v1338_v52  ;;  %1363 = vmatpush.bf16.msra.mxu3 %v1338_v52 }
 0x11a   :  { %v422_v53 = vpop.f32.mrf.mxu0 }
 0x11b   :  { %v423_v54 = vadd.f32 %v1803_v43, %v422_v53 }
 0x11d   :  { %v483_v56 = vmax.f32 %v423_v54, 0.0 }
 0x11f   :  { %v507_v57 = vpack.c.bf16 %v483_v56, %v482_v55  ;;  %v1337_v56 = vld [vmem:[%s2279_s5 + $0x10] sm:$0xff] }
 0x120   :  { %769 = vmatpush.bf16.msra.mxu2 %v1337_v56  ;;  %1364 = vmatpush.bf16.msra.mxu3 %v1337_v56 }
 0x121   :  { %598 = vmatmul.bf16.gmra.mxu1 %v507_v57 }
 0x122   :  { %v425_v58 = vpop.f32.mrf.mxu0 }
 0x123   :  { %v426_v60 = vadd.f32 %v1803_v43, %v425_v58  ;;  %v1336_v58 = vld [vmem:[%s2279_s5 + $0x8] sm:$0xff] }
 0x124   :  { %770 = vmatpush.bf16.msra.mxu2 %v1336_v58  ;;  %1365 = vmatpush.bf16.msra.mxu3 %v1336_v58 }
 0x125   :  { %v484_v63 = vmax.f32 %v426_v60, 0.0 }
 0x128   :  { %v465_v59 = vpop.f32.mrf.mxu3 }
 0x129   :  { %v466_v0 = vadd.f32 %v1803_v43, %v465_v59  ;;  %v1335_v59 = vld [vmem:[%s2279_s5] sm:$0xff] }
 0x12a   :  { %v427_v61 = vpop.f32.mrf.mxu0  ;;  %771 = vmatpush.bf16.msra.mxu2 %v1335_v59  ;;  %1366 = vmatpush.bf16.msra.mxu3 %v1335_v59 }
 0x12b   :  { %v428_v62 = vadd.f32 %v1803_v43, %v427_v61  ;;  %v500_v4 = vmax.f32 %v466_v0, 0.0 }
 0x12d   :  { %v485_v1 = vmax.f32 %v428_v62, 0.0 }
 0x12f   :  { %v508_v2 = vpack.c.bf16 %v485_v1, %v484_v63 }
 0x130   :  { %v467_v3 = vpop.f32.mrf.mxu3 }
 0x131   :  { %v468_v5 = vadd.f32 %v1803_v43, %v467_v3  ;;  %603 = vmatmul.bf16.gmra.mxu1 %v508_v2 }
 0x132   :  { %v430_v6 = vpop.f32.mrf.mxu0 }
 0x133   :  { %v501_v7 = vmax.f32 %v468_v5, 0.0  ;;  %v431_v10 = vadd.f32 %v1803_v43, %v430_v6 }
 0x135   :  { %v516_v8 = vpack.c.bf16 %v501_v7, %v500_v4  ;;  %v486_v13 = vmax.f32 %v431_v10, 0.0  ;;  %v1856_v10 = vld [vmem:[%s2277_s3 + $0x1] ss:$0 sm:$0xff] }
 0x137   :  { %643 = vmatmul.bf16.vlgmr.msrb.gmra.mxu3 %v516_v8 }
 0x138   :  { %v470_v9 = vpop.f32.mrf.mxu3 }
 0x139   :  { %v471_v14 = vadd.f32 %v1803_v43, %v470_v9 }
 0x13a   :  { %v432_v11 = vpop.f32.mrf.mxu0 }
 0x13b   :  { %v433_v12 = vadd.f32 %v1803_v43, %v432_v11  ;;  %v502_v18 = vmax.f32 %v471_v14, 0.0 }
 0x13d   :  { %v487_v15 = vmax.f32 %v433_v12, 0.0 }
 0x13f   :  { %v509_v16 = vpack.c.bf16 %v487_v15, %v486_v13 }
 0x140   :  { %v472_v17 = vpop.f32.mrf.mxu3 }
 0x141   :  { %v473_v19 = vadd.f32 %v1803_v43, %v472_v17  ;;  %608 = vmatmul.bf16.gmra.mxu1 %v509_v16 }
 0x142   :  { %v435_v20 = vpop.f32.mrf.mxu0 }
 0x143   :  { %v503_v21 = vmax.f32 %v473_v19, 0.0  ;;  %v436_v24 = vadd.f32 %v1803_v43, %v435_v20 }
 0x145   :  { %v517_v22 = vpack.c.bf16 %v503_v21, %v502_v18  ;;  %v488_v27 = vmax.f32 %v436_v24, 0.0 }
 0x147   :  { %648 = vmatmul.bf16.gmra.mxu3 %v517_v22 }
 0x148   :  { %v475_v23 = vpop.f32.mrf.mxu3 }
 0x149   :  { %v476_v28 = vadd.f32 %v1803_v43, %v475_v23 }
 0x14a   :  { %v437_v25 = vpop.f32.mrf.mxu0 }
 0x14b   :  { %v438_v26 = vadd.f32 %v1803_v43, %v437_v25  ;;  %v504_v32 = vmax.f32 %v476_v28, 0.0 }
 0x14d   :  { %v489_v29 = vmax.f32 %v438_v26, 0.0 }
 0x14f   :  { %v510_v30 = vpack.c.bf16 %v489_v29, %v488_v27 }
 0x150   :  { %v477_v31 = vpop.f32.mrf.mxu3 }
 0x151   :  { %v478_v33 = vadd.f32 %v1803_v43, %v477_v31  ;;  %613 = vmatmul.bf16.gmra.mxu1 %v510_v30 }
 0x152   :  { %v440_v34 = vpop.f32.mrf.mxu0 }
 0x153   :  { %v505_v35 = vmax.f32 %v478_v33, 0.0  ;;  %v441_v37 = vadd.f32 %v1803_v43, %v440_v34 }
 0x155   :  { %v518_v36 = vpack.c.bf16 %v505_v35, %v504_v32  ;;  %v490_v41 = vmax.f32 %v441_v37, 0.0 }
 0x157   :  { %653 = vmatmul.bf16.gmra.mxu3 %v518_v36 }
 0x15a   :  { %v442_v38 = vpop.f32.mrf.mxu0 }
 0x15b   :  { %v443_v39 = vadd.f32 %v1803_v43, %v442_v38 }
 0x15d   :  { %v491_v42 = vmax.f32 %v443_v39, 0.0 }
 0x15f   :  { %v511_v44 = vpack.c.bf16 %v491_v42, %v490_v41 }
 0x161   :  { %618 = vmatmul.bf16.gmra.mxu1 %v511_v44 }
 0x162   :  { %v445_v46 = vpop.f32.mrf.mxu0 }
 0x163   :  { %v446_v49 = vadd.f32 %v1803_v43, %v445_v46 }
 0x165   :  { %v492_v53 = vmax.f32 %v446_v49, 0.0 }
 0x16a   :  { %v447_v50 = vpop.f32.mrf.mxu0 }
 0x16b   :  { %v448_v51 = vadd.f32 %v1803_v43, %v447_v50 }
 0x16d   :  { %v493_v54 = vmax.f32 %v448_v51, 0.0 }
 0x16f   :  { %v512_v55 = vpack.c.bf16 %v493_v54, %v492_v53 }
 0x171   :  { %623 = vmatmul.bf16.gmra.mxu1 %v512_v55 }
 0x172   :  { %v450_v57 = vpop.f32.mrf.mxu0 }
 0x173   :  { %v451_v60 = vadd.f32 %v1803_v43, %v450_v57 }
 0x175   :  { %v494_v63 = vmax.f32 %v451_v60, 0.0 }
 0x17a   :  { %v452_v61 = vpop.f32.mrf.mxu0 }
 0x17b   :  { %v453_v62 = vadd.f32 %v1803_v43, %v452_v61 }
 0x17d   :  { %v495_v0 = vmax.f32 %v453_v62, 0.0 }
 0x17f   :  { %v513_v1 = vpack.c.bf16 %v495_v0, %v494_v63 }
 0x181   :  { %628 = vmatmul.bf16.gmra.mxu1 %v513_v1 }
 0x182   :  { %v455_v2 = vpop.f32.mrf.mxu0 }
 0x183   :  { %v456_v3 = vadd.f32 %v1803_v43, %v455_v2 }
 0x185   :  { %v496_v6 = vmax.f32 %v456_v3, 0.0 }
 0x18a   :  { %v457_v4 = vpop.f32.mrf.mxu0 }
 0x18b   :  { %v458_v5 = vadd.f32 %v1803_v43, %v457_v4 }
 0x18d   :  { %v497_v7 = vmax.f32 %v458_v5, 0.0 }
 0x18e   :  { %v594_v8 = vpop.f32.mrf.mxu1 }
 0x18f   :  { %v514_v9 = vpack.c.bf16 %v497_v7, %v496_v6  ;;  %v595_v12 = vadd.f32 %v1856_v10, %v594_v8 }
 0x191   :  { %633 = vmatmul.bf16.gmra.mxu1 %v514_v9  ;;  %v659_v15 = vmax.f32 %v595_v12, 0.0 }
 0x192   :  { %v460_v11 = vpop.f32.mrf.mxu0 }
 0x193   :  { %v461_v16 = vadd.f32 %v1803_v43, %v460_v11 }
 0x195   :  { %v498_v21 = vmax.f32 %v461_v16, 0.0 }
 0x196   :  { %v596_v13 = vpop.f32.mrf.mxu1 }
 0x197   :  { %v597_v14 = vadd.f32 %v1856_v10, %v596_v13 }
 0x199   :  { %v660_v17 = vmax.f32 %v597_v14, 0.0 }
 0x19a   :  { %v462_v18 = vpop.f32.mrf.mxu0 }
 0x19b   :  { %v463_v19 = vadd.f32 %v1803_v43, %v462_v18  ;;  %v685_v20 = vpack.c.bf16 %v660_v17, %v659_v15 }
 0x19d   :  { %v499_v22 = vmax.f32 %v463_v19, 0.0  ;;  %772 = vmatmul.bf16.vlgmr.msra.gmra.mxu2 %v685_v20 }
 0x19e   :  { %v599_v23 = vpop.f32.mrf.mxu1 }
 0x19f   :  { %v515_v24 = vpack.c.bf16 %v499_v22, %v498_v21  ;;  %v600_v25 = vadd.f32 %v1856_v10, %v599_v23 }
 0x1a1   :  { %638 = vmatmul.bf16.gmra.mxu1 %v515_v24  ;;  %v661_v28 = vmax.f32 %v600_v25, 0.0 }
 0x1a6   :  { %v601_v26 = vpop.f32.mrf.mxu1 }
 0x1a7   :  { %v602_v27 = vadd.f32 %v1856_v10, %v601_v26 }
 0x1a9   :  { %v662_v29 = vmax.f32 %v602_v27, 0.0 }
 0x1ab   :  { %v686_v30 = vpack.c.bf16 %v662_v29, %v661_v28 }
 0x1ad   :  { %777 = vmatmul.bf16.gmra.mxu2 %v686_v30 }
 0x1ae   :  { %v604_v31 = vpop.f32.mrf.mxu1 }
 0x1af   :  { %v605_v32 = vadd.f32 %v1856_v10, %v604_v31 }
 0x1b1   :  { %v663_v34 = vmax.f32 %v605_v32, 0.0 }
 0x1b6   :  { %v606_v43 = vpop.f32.mrf.mxu1 }
 0x1b7   :  { %v607_v33 = vadd.f32 %v1856_v10, %v606_v43 }
 0x1b9   :  { %v664_v35 = vmax.f32 %v607_v33, 0.0 }
 0x1ba   :  { %v644_v36 = vpop.f32.mrf.mxu3 }
 0x1bb   :  { %v687_v37 = vpack.c.bf16 %v664_v35, %v663_v34  ;;  %v645_v39 = vadd.f32 %v1856_v10, %v644_v36 }
 0x1bd   :  { %782 = vmatmul.bf16.gmra.mxu2 %v687_v37  ;;  %v679_v41 = vmax.f32 %v645_v39, 0.0  ;;  %v1887_v37 = vld [vmem:[%s2280_s6] ss:$0 sm:$0xff] }
 0x1be   :  { %v609_v38 = vpop.f32.mrf.mxu1 }
 0x1bf   :  { %v610_v44 = vadd.f32 %v1856_v10, %v609_v38 }
 0x1c1   :  { %v665_v49 = vmax.f32 %v610_v44, 0.0 }
 0x1c2   :  { %v646_v40 = vpop.f32.mrf.mxu3 }
 0x1c3   :  { %v647_v42 = vadd.f32 %v1856_v10, %v646_v40 }
 0x1c5   :  { %v680_v45 = vmax.f32 %v647_v42, 0.0 }
 0x1c6   :  { %v611_v46 = vpop.f32.mrf.mxu1 }
 0x1c7   :  { %v695_v47 = vpack.c.bf16 %v680_v45, %v679_v41  ;;  %v612_v48 = vadd.f32 %v1856_v10, %v611_v46 }
 0x1c9   :  { %v666_v50 = vmax.f32 %v612_v48, 0.0  ;;  %822 = vmatmul.bf16.vlgmr.msra.gmra.mxu3 %v695_v47 }
 0x1ca   :  { %v649_v51 = vpop.f32.mrf.mxu3 }
 0x1cb   :  { %v688_v52 = vpack.c.bf16 %v666_v50, %v665_v49  ;;  %v650_v54 = vadd.f32 %v1856_v10, %v649_v51 }
 0x1cd   :  { %787 = vmatmul.bf16.gmra.mxu2 %v688_v52  ;;  %v681_v56 = vmax.f32 %v650_v54, 0.0 }
 0x1ce   :  { %v614_v53 = vpop.f32.mrf.mxu1 }
 0x1cf   :  { %v615_v58 = vadd.f32 %v1856_v10, %v614_v53 }
 0x1d1   :  { %v667_v63 = vmax.f32 %v615_v58, 0.0 }
 0x1d2   :  { %v651_v55 = vpop.f32.mrf.mxu3 }
 0x1d3   :  { %v652_v57 = vadd.f32 %v1856_v10, %v651_v55 }
 0x1d5   :  { %v682_v59 = vmax.f32 %v652_v57, 0.0 }
 0x1d6   :  { %v616_v60 = vpop.f32.mrf.mxu1 }
 0x1d7   :  { %v617_v61 = vadd.f32 %v1856_v10, %v616_v60  ;;  %v696_v62 = vpack.c.bf16 %v682_v59, %v681_v56 }
 0x1d9   :  { %v668_v0 = vmax.f32 %v617_v61, 0.0  ;;  %827 = vmatmul.bf16.gmra.mxu3 %v696_v62 }
 0x1da   :  { %v654_v1 = vpop.f32.mrf.mxu3 }
 0x1db   :  { %v689_v2 = vpack.c.bf16 %v668_v0, %v667_v63  ;;  %v655_v4 = vadd.f32 %v1856_v10, %v654_v1 }
 0x1dd   :  { %792 = vmatmul.bf16.gmra.mxu2 %v689_v2  ;;  %v683_v6 = vmax.f32 %v655_v4, 0.0 }
 0x1de   :  { %v619_v3 = vpop.f32.mrf.mxu1 }
 0x1df   :  { %v620_v8 = vadd.f32 %v1856_v10, %v619_v3 }
 0x1e1   :  { %v669_v14 = vmax.f32 %v620_v8, 0.0 }
 0x1e2   :  { %v656_v5 = vpop.f32.mrf.mxu3 }
 0x1e3   :  { %v657_v7 = vadd.f32 %v1856_v10, %v656_v5 }
 0x1e5   :  { %v684_v9 = vmax.f32 %v657_v7, 0.0 }
 0x1e6   :  { %v621_v11 = vpop.f32.mrf.mxu1 }
 0x1e7   :  { %v622_v12 = vadd.f32 %v1856_v10, %v621_v11  ;;  %v697_v13 = vpack.c.bf16 %v684_v9, %v683_v6 }
 0x1e9   :  { %v670_v15 = vmax.f32 %v622_v12, 0.0  ;;  %832 = vmatmul.bf16.gmra.mxu3 %v697_v13 }
 0x1eb   :  { %v690_v16 = vpack.c.bf16 %v670_v15, %v669_v14 }
 0x1ed   :  { %797 = vmatmul.bf16.gmra.mxu2 %v690_v16 }
 0x1ee   :  { %v624_v17 = vpop.f32.mrf.mxu1 }
 0x1ef   :  { %v625_v18 = vadd.f32 %v1856_v10, %v624_v17 }
 0x1f1   :  { %v671_v21 = vmax.f32 %v625_v18, 0.0 }
 0x1f6   :  { %v626_v19 = vpop.f32.mrf.mxu1 }
 0x1f7   :  { %v627_v20 = vadd.f32 %v1856_v10, %v626_v19 }
 0x1f9   :  { %v672_v22 = vmax.f32 %v627_v20, 0.0 }
 0x1fb   :  { %v691_v23 = vpack.c.bf16 %v672_v22, %v671_v21 }
 0x1fd   :  { %802 = vmatmul.bf16.gmra.mxu2 %v691_v23 }
 0x1fe   :  { %v629_v24 = vpop.f32.mrf.mxu1 }
 0x1ff   :  { %v630_v25 = vadd.f32 %v1856_v10, %v629_v24 }
 0x201   :  { %v673_v28 = vmax.f32 %v630_v25, 0.0 }
 0x206   :  { %v631_v26 = vpop.f32.mrf.mxu1 }
 0x207   :  { %v632_v27 = vadd.f32 %v1856_v10, %v631_v26 }
 0x209   :  { %v674_v29 = vmax.f32 %v632_v27, 0.0 }
 0x20b   :  { %v692_v30 = vpack.c.bf16 %v674_v29, %v673_v28 }
 0x20d   :  { %807 = vmatmul.bf16.gmra.mxu2 %v692_v30 }
 0x20e   :  { %v634_v31 = vpop.f32.mrf.mxu1 }
 0x20f   :  { %v635_v32 = vadd.f32 %v1856_v10, %v634_v31 }
 0x211   :  { %v675_v34 = vmax.f32 %v635_v32, 0.0 }
 0x216   :  { %v636_v43 = vpop.f32.mrf.mxu1 }
 0x217   :  { %v637_v33 = vadd.f32 %v1856_v10, %v636_v43 }
 0x219   :  { %v676_v35 = vmax.f32 %v637_v33, 0.0 }
 0x21b   :  { %v693_v36 = vpack.c.bf16 %v676_v35, %v675_v34 }
 0x21d   :  { %812 = vmatmul.bf16.gmra.mxu2 %v693_v36 }
 0x21e   :  { %v639_v38 = vpop.f32.mrf.mxu1 }
 0x21f   :  { %v640_v41 = vadd.f32 %v1856_v10, %v639_v38 }
 0x220   :  { %v773_v39 = vpop.f32.mrf.mxu2 }
 0x221   :  { %v1890_v40 = vadd.f32 %v1887_v37, %v773_v39  ;;  %v677_v46 = vmax.f32 %v640_v41, 0.0 }
 0x223   :  { %838 = vmax.xlane.f32.xlu2 %v1890_v40 }
 0x226   :  { %v641_v42 = vpop.f32.mrf.mxu1 }
 0x227   :  { %v642_v44 = vadd.f32 %v1856_v10, %v641_v42 }
 0x228   :  { %v775_v45 = vpop.f32.mrf.mxu2 }
 0x229   :  { %v678_v47 = vmax.f32 %v642_v44, 0.0  ;;  %v1896_v48 = vadd.f32 %v1887_v37, %v775_v45 }
 0x22b   :  { %840 = vmax.xlane.f32.xlu0 %v1896_v48  ;;  %v694_v49 = vpack.c.bf16 %v678_v47, %v677_v46 }
 0x22d   :  { %817 = vmatmul.bf16.gmra.mxu2 %v694_v49 }
 0x230   :  { %v778_v50 = vpop.f32.mrf.mxu2 }
 0x231   :  { %v1900_v51 = vadd.f32 %v1887_v37, %v778_v50 }
 0x233   :  { %842 = vmax.xlane.f32.xlu1 %v1900_v51 }
 0x238   :  { %v780_v52 = vpop.f32.mrf.mxu2 }
 0x239   :  { %v1904_v53 = vadd.f32 %v1887_v37, %v780_v52 }
 0x23b   :  { %844 = vmax.xlane.f32.xlu2 %v1904_v53 }
 0x240   :  { %v783_v10 = vpop.f32.mrf.mxu2 }
 0x241   :  { %v1920_v1 = vadd.f32 %v1887_v37, %v783_v10 }
 0x248   :  { %v785_v54 = vpop.f32.mrf.mxu2 }
 0x249   :  { %v1928_v5 = vadd.f32 %v1887_v37, %v785_v54 }
 0x24c   :  { %v823_v55 = vpop.f32.mrf.mxu3 }
 0x24d   :  { %v1908_v56 = vadd.f32 %v1887_v37, %v823_v55 }
 0x24f   :  { %878 = vmax.xlane.f32.xlu0 %v1908_v56 }
 0x250   :  { %v788_v57 = vpop.f32.mrf.mxu2 }
 0x251   :  { %v1936_v9 = vadd.f32 %v1887_v37, %v788_v57 }
 0x254   :  { %v825_v58 = vpop.f32.mrf.mxu3 }
 0x255   :  { %v1912_v59 = vadd.f32 %v1887_v37, %v825_v58 }
 0x257   :  { %880 = vmax.xlane.f32.xlu1 %v1912_v59 }
 0x258   :  { %v790_v60 = vpop.f32.mrf.mxu2 }
 0x259   :  { %v1954_v16 = vadd.f32 %v1887_v37, %v790_v60 }
 0x25c   :  { %v828_v61 = vpop.f32.mrf.mxu3 }
 0x25d   :  { %v1916_v62 = vadd.f32 %v1887_v37, %v828_v61 }
 0x25f   :  { %882 = vmax.xlane.f32.xlu2 %v1916_v62 }
 0x260   :  { %v793_v63 = vpop.f32.mrf.mxu2 }
 0x261   :  { %v1939_v11 = vadd.f32 %v1887_v37, %v793_v63 }
 0x264   :  { %v830_v0 = vpop.f32.mrf.mxu3 }
 0x265   :  { %v1923_v2 = vadd.f32 %v1887_v37, %v830_v0 }
 0x267   :  { %884 = vmax.xlane.f32.xlu0 %v1923_v2  ;;  %846 = vmax.xlane.f32.xlu2 %v1920_v1 }
 0x268   :  { %v795_v3 = vpop.f32.mrf.mxu2 }
 0x269   :  { %v1948_v14 = vadd.f32 %v1887_v37, %v795_v3 }
 0x26c   :  { %v833_v4 = vpop.f32.mrf.mxu3 }
 0x26d   :  { %v1931_v6 = vadd.f32 %v1887_v37, %v833_v4 }
 0x26f   :  { %886 = vmax.xlane.f32.xlu1 %v1931_v6  ;;  %848 = vmax.xlane.f32.xlu0 %v1928_v5 }
 0x270   :  { %v798_v7 = vpop.f32.mrf.mxu2 }
 0x271   :  { %v1963_v19 = vadd.f32 %v1887_v37, %v798_v7 }
 0x274   :  { %v835_v8 = vpop.f32.mrf.mxu3 }
 0x275   :  { %v1942_v12 = vadd.f32 %v1887_v37, %v835_v8 }
 0x277   :  { %850 = vmax.xlane.f32.xlu1 %v1936_v9  ;;  %854 = vmax.xlane.f32.xlu0 %v1939_v11 }
 0x278   :  { %888 = vmax.xlane.f32.xlu2 %v1942_v12  ;;  %v800_v13 = vpop.f32.mrf.mxu2 }
 0x279   :  { %v1951_v15 = vadd.f32 %v1887_v37, %v800_v13 }
 0x27f   :  { %856 = vmax.xlane.f32.xlu1 %v1948_v14  ;;  %860 = vmax.xlane.f32.xlu0 %v1951_v15 }
 0x280   :  { %852 = vmax.xlane.f32.xlu2 %v1954_v16  ;;  %v803_v17 = vpop.f32.mrf.mxu2 }
 0x281   :  { %v1960_v18 = vadd.f32 %v1887_v37, %v803_v17 }
 0x287   :  { %862 = vmax.xlane.f32.xlu1 %v1960_v18 }
 0x288   :  { %858 = vmax.xlane.f32.xlu2 %v1963_v19  ;;  %v805_v20 = vpop.f32.mrf.mxu2 }
 0x289   :  { %v1968_v21 = vadd.f32 %v1887_v37, %v805_v20 }
 0x290   :  { %864 = vmax.xlane.f32.xlu2 %v1968_v21  ;;  %v808_v22 = vpop.f32.mrf.mxu2 }
 0x291   :  { %v1972_v23 = vadd.f32 %v1887_v37, %v808_v22 }
 0x293   :  { %866 = vmax.xlane.f32.xlu0 %v1972_v23 }
 0x296   :  { %v839_v24 = vpop.xlane.xlu2 %838 }
 0x297   :  { %v890_v25 = vsub.f32 %v1890_v40, %v839_v24 }
 0x298   :  { %v810_v26 = vpop.f32.mrf.mxu2 }
 0x299   :  { %v916_v27 = vmul.f32 1.442695, %v890_v25  ;;  %v1977_v28 = vadd.f32 %v1887_v37, %v810_v26 }
 0x29b   :  { %1373 = vpow2.f32 %v916_v27  ;;  %868 = vmax.xlane.f32.xlu1 %v1977_v28 }
 0x29e   :  { %v841_v29 = vpop.xlane.xlu0 %840 }
 0x29f   :  { %v891_v30 = vsub.f32 %v1896_v48, %v841_v29 }
 0x2a0   :  { %v813_v31 = vpop.f32.mrf.mxu2 }
 0x2a1   :  { %v1981_v32 = vpop.eup %1373  ;;  %v918_v43 = vmul.f32 1.442695, %v891_v30  ;;  %v1984_v33 = vadd.f32 %v1887_v37, %v813_v31 }
 0x2a2   :  { %968 = vadd.xlane.f32.xlu0 %v1981_v32 }
 0x2a3   :  { %1375 = vpow2.f32 %v918_v43  ;;  %870 = vmax.xlane.f32.xlu2 %v1984_v33 }
 0x2a6   :  { %v843_v34 = vpop.xlane.xlu1 %842 }
 0x2a7   :  { %v892_v35 = vsub.f32 %v1900_v51, %v843_v34 }
 0x2a8   :  { %v815_v36 = vpop.f32.mrf.mxu2 }
 0x2a9   :  { %v1989_v38 = vpop.eup %1375  ;;  %v920_v39 = vmul.f32 1.442695, %v892_v35  ;;  %v1992_v40 = vadd.f32 %v1887_v37, %v815_v36 }
 0x2aa   :  { %970 = vadd.xlane.f32.xlu1 %v1989_v38 }
 0x2ab   :  { %1377 = vpow2.f32 %v920_v39  ;;  %872 = vmax.xlane.f32.xlu0 %v1992_v40 }
 0x2ae   :  { %v845_v41 = vpop.xlane.xlu2 %844 }
 0x2af   :  { %v893_v42 = vsub.f32 %v1904_v53, %v845_v41 }
 0x2b0   :  { %v818_v44 = vpop.f32.mrf.mxu2 }
 0x2b1   :  { %v1997_v45 = vpop.eup %1377  ;;  %v922_v46 = vmul.f32 1.442695, %v893_v42  ;;  %v2000_v47 = vadd.f32 %v1887_v37, %v818_v44 }
 0x2b2   :  { %972 = vadd.xlane.f32.xlu2 %v1997_v45 }
 0x2b3   :  { %1379 = vpow2.f32 %v922_v46  ;;  %874 = vmax.xlane.f32.xlu1 %v2000_v47 }
 0x2b8   :  { %v820_v48 = vpop.f32.mrf.mxu2 }
 0x2b9   :  { %v2004_v49 = vpop.eup %1379  ;;  %v2007_v50 = vadd.f32 %v1887_v37, %v820_v48 }
 0x2ba   :  { %974 = vadd.xlane.f32.xlu0 %v2004_v49 }
 0x2bb   :  { %876 = vmax.xlane.f32.xlu2 %v2007_v50 }
 0x2c2   :  { %v879_v51 = vpop.xlane.xlu0 %878 }
 0x2c3   :  { %v910_v52 = vsub.f32 %v1908_v56, %v879_v51 }
 0x2c5   :  { %v956_v53 = vmul.f32 1.442695, %v910_v52 }
 0x2c7   :  { %1381 = vpow2.f32 %v956_v53 }
 0x2ca   :  { %v881_v10 = vpop.xlane.xlu1 %880 }
 0x2cb   :  { %v911_v54 = vsub.f32 %v1912_v59, %v881_v10 }
 0x2cd   :  { %v2013_v55 = vpop.eup %1381  ;;  %v958_v57 = vmul.f32 1.442695, %v911_v54 }
 0x2ce   :  { %1008 = vadd.xlane.f32.xlu2 %v2013_v55 }
 0x2cf   :  { %1383 = vpow2.f32 %v958_v57 }
 0x2d2   :  { %v883_v37 = vpop.xlane.xlu2 %882 }
 0x2d3   :  { %v912_v58 = vsub.f32 %v1916_v62, %v883_v37 }
 0x2d5   :  { %v2017_v60 = vpop.eup %1383  ;;  %v960_v61 = vmul.f32 1.442695, %v912_v58 }
 0x2d6   :  { %1010 = vadd.xlane.f32.xlu0 %v2017_v60 }
 0x2d7   :  { %1385 = vpow2.f32 %v960_v61 }
 0x2da   :  { %v2020_v56 = vpop.xlane.xlu0 %884  ;;  %v847_v63 = vpop.xlane.xlu2 %846 }
 0x2db   :  { %v894_v59 = vsub.f32 %v1920_v1, %v847_v63 }
 0x2dd   :  { %v2023_v0 = vpop.eup %1385  ;;  %v924_v3 = vmul.f32 1.442695, %v894_v59 }
 0x2de   :  { %1012 = vadd.xlane.f32.xlu1 %v2023_v0 }
 0x2df   :  { %1387 = vpow2.f32 %v924_v3 }
 0x2e2   :  { %v2026_v4 = vpop.xlane.xlu1 %886  ;;  %v849_v62 = vpop.xlane.xlu0 %848 }
 0x2e3   :  { %v895_v7 = vsub.f32 %v1928_v5, %v849_v62 }
 0x2e5   :  { %v926_v8 = vmul.f32 1.442695, %v895_v7  ;;  %v2029_v13 = vpop.eup %1387 }
 0x2e6   :  { %976 = vadd.xlane.f32.xlu1 %v2029_v13 }
 0x2e7   :  { %1389 = vpow2.f32 %v926_v8 }
 0x2ea   :  { %v851_v17 = vpop.xlane.xlu1 %850  ;;  %v855_v20 = vpop.xlane.xlu0 %854 }
 0x2eb   :  { %v896_v1 = vsub.f32 %v1936_v9, %v851_v17  ;;  %v898_v22 = vsub.f32 %v1939_v11, %v855_v20  ;;  %v2034_v24 = vpop.xlane.xlu2 %888  ;;  %v2086_v20 = vld [vmem:[%s2280_s6 + $0x2] ss:$0 sm:$0xff] }
 0x2ed   :  { %v928_v25 = vmul.f32 1.442695, %v896_v1  ;;  %v932_v26 = vmul.f32 1.442695, %v898_v22  ;;  %v2036_v27 = vpop.eup %1389 }
 0x2ee   :  { %978 = vadd.xlane.f32.xlu2 %v2036_v27 }
 0x2ef   :  { %1391 = vpow2.f32 %v928_v25 }
 0x2f0   :  { %1393 = vpow2.f32 %v932_v26 }
 0x2f2   :  { %v857_v5 = vpop.xlane.xlu1 %856  ;;  %v861_v29 = vpop.xlane.xlu0 %860 }
 0x2f3   :  { %v899_v30 = vsub.f32 %v1948_v14, %v857_v5  ;;  %v901_v31 = vsub.f32 %v1951_v15, %v861_v29  ;;  %v853_v43 = vpop.xlane.xlu2 %852 }
 0x2f4   :  { %v897_v9 = vsub.f32 %v1954_v16, %v853_v43 }
 0x2f5   :  { %v2042_v11 = vpop.eup %1391  ;;  %v934_v34 = vmul.f32 1.442695, %v899_v30  ;;  %v938_v35 = vmul.f32 1.442695, %v901_v31  ;;  %v913_v31 = vsub.f32 %v1923_v2, %v2020_v56 }
 0x2f6   :  { %v2044_v36 = vpop.eup %1393  ;;  %v930_v39 = vmul.f32 1.442695, %v897_v9  ;;  %980 = vadd.xlane.f32.xlu0 %v2042_v11 }
 0x2f7   :  { %1395 = vpow2.f32 %v934_v34  ;;  %984 = vadd.xlane.f32.xlu2 %v2044_v36 }
 0x2f8   :  { %1397 = vpow2.f32 %v938_v35 }
 0x2f9   :  { %1399 = vpow2.f32 %v930_v39 }
 0x2fa   :  { %v863_v14 = vpop.xlane.xlu1 %862 }
 0x2fb   :  { %v902_v15 = vsub.f32 %v1960_v18, %v863_v14  ;;  %v859_v41 = vpop.xlane.xlu2 %858 }
 0x2fc   :  { %v900_v16 = vsub.f32 %v1963_v19, %v859_v41 }
 0x2fd   :  { %v2050_v42 = vpop.eup %1395  ;;  %v940_v44 = vmul.f32 1.442695, %v902_v15  ;;  %v914_v15 = vsub.f32 %v1931_v6, %v2026_v4 }
 0x2fe   :  { %v2052_v46 = vpop.eup %1397  ;;  %v936_v48 = vmul.f32 1.442695, %v900_v16  ;;  %986 = vadd.xlane.f32.xlu0 %v2050_v42 }
 0x2ff   :  { %v2055_v51 = vpop.eup %1399  ;;  %1401 = vpow2.f32 %v940_v44  ;;  %990 = vadd.xlane.f32.xlu2 %v2052_v46  ;;  %v964_v16 = vmul.f32 1.442695, %v914_v15 }
 0x300   :  { %1403 = vpow2.f32 %v936_v48  ;;  %982 = vadd.xlane.f32.xlu1 %v2055_v51 }
 0x303   :  { %v865_v18 = vpop.xlane.xlu2 %864 }
 0x304   :  { %v903_v52 = vsub.f32 %v1968_v21, %v865_v18 }
 0x305   :  { %v2060_v19 = vpop.eup %1401 }
 0x306   :  { %v2062_v53 = vpop.eup %1403  ;;  %v942_v10 = vmul.f32 1.442695, %v903_v52  ;;  %v867_v54 = vpop.xlane.xlu0 %866  ;;  %992 = vadd.xlane.f32.xlu0 %v2060_v19 }
 0x307   :  { %v904_v57 = vsub.f32 %v1972_v23, %v867_v54 }
 0x308   :  { %1405 = vpow2.f32 %v942_v10  ;;  %988 = vadd.xlane.f32.xlu1 %v2062_v53 }
 0x309   :  { %v944_v37 = vmul.f32 1.442695, %v904_v57 }
 0x30b   :  { %1407 = vpow2.f32 %v944_v37 }
 0x30e   :  { %v2067_v58 = vpop.eup %1405  ;;  %v869_v61 = vpop.xlane.xlu1 %868 }
 0x30f   :  { %v905_v21 = vsub.f32 %v1977_v28, %v869_v61  ;;  %v2081_v28 = vld [vmem:[%s2280_s6 + $0x1] ss:$0 sm:$0xff] }
 0x310   :  { %994 = vadd.xlane.f32.xlu1 %v2067_v58 }
 0x311   :  { %v2071_v63 = vpop.eup %1407  ;;  %v946_v59 = vmul.f32 1.442695, %v905_v21 }
 0x312   :  { %996 = vadd.xlane.f32.xlu2 %v2071_v63 }
 0x313   :  { %1409 = vpow2.f32 %v946_v59 }
 0x315   :  { %v969_v3 = vpop.xlane.xlu0 %968 }
 0x316   :  { %1411 = vrcp.f32 %v969_v3  ;;  %v871_v23 = vpop.xlane.xlu2 %870 }
 0x317   :  { %v906_v62 = vsub.f32 %v1984_v33, %v871_v23 }
 0x319   :  { %v2075_v7 = vpop.eup %1409  ;;  %v948_v8 = vmul.f32 1.442695, %v906_v62 }
 0x31a   :  { %998 = vadd.xlane.f32.xlu0 %v2075_v7 }
 0x31b   :  { %1413 = vpow2.f32 %v948_v8 }
 0x31c   :  { %v1412_v17 = vpop.eup %1411 }
 0x31d   :  { %v1046_v1 = vmul.f32 %v1412_v17, %v1981_v32  ;;  %v971_v33 = vpop.xlane.xlu1 %970 }
 0x31e   :  { %1415 = vrcp.f32 %v971_v33  ;;  %v873_v22 = vpop.xlane.xlu0 %872 }
 0x31f   :  { %v1074_v25 = vmul.f32 %v2081_v28, %v1046_v1  ;;  %v907_v26 = vsub.f32 %v1992_v40, %v873_v22  ;;  %v962_v40 = vmul.f32 1.442695, %v913_v31 }
 0x321   :  { %v2091_v5 = vpop.eup %1413  ;;  %v1102_v29 = vadd.f32 %v2086_v20, %v1074_v25  ;;  %v950_v30 = vmul.f32 1.442695, %v907_v26 }
 0x322   :  { %1000 = vadd.xlane.f32.xlu1 %v2091_v5 }
 0x323   :  { %1128 = vst [vmem:[%s2281_s7] sm:$0xff] %v1102_v29  ;;  %1417 = vpow2.f32 %v950_v30 }
 0x324   :  { %v1416_v32 = vpop.eup %1415 }
 0x325   :  { %v1047_v43 = vmul.f32 %v1416_v32, %v1989_v38  ;;  %v973_v9 = vpop.xlane.xlu2 %972 }
 0x326   :  { %1419 = vrcp.f32 %v973_v9  ;;  %v875_v34 = vpop.xlane.xlu1 %874 }
 0x327   :  { %v1075_v35 = vmul.f32 %v2081_v28, %v1047_v43  ;;  %v908_v39 = vsub.f32 %v2000_v47, %v875_v34  ;;  %1421 = vpow2.f32 %v962_v40 }
 0x329   :  { %v2103_v14 = vpop.eup %1417  ;;  %v1103_v2 = vadd.f32 %v2086_v20, %v1075_v35  ;;  %v952_v56 = vmul.f32 1.442695, %v908_v39 }
 0x32a   :  { %1002 = vadd.xlane.f32.xlu2 %v2103_v14 }
 0x32b   :  { %1129 = vst [vmem:[%s2281_s7 + $0x8] sm:$0xff] %v1103_v2  ;;  %1423 = vpow2.f32 %v952_v56 }
 0x32c   :  { %v1420_v38 = vpop.eup %1419 }
 0x32d   :  { %v1048_v41 = vmul.f32 %v1420_v38, %v1997_v45  ;;  %v975_v47 = vpop.xlane.xlu0 %974  ;;  %v2115_v52 = vpop.eup %1421  ;;  %v915_v45 = vsub.f32 %v1942_v12, %v2034_v24 }
 0x32e   :  { %1425 = vrcp.f32 %v975_v47  ;;  %v877_v44 = vpop.xlane.xlu2 %876 }
 0x32f   :  { %v1076_v48 = vmul.f32 %v2081_v28, %v1048_v41  ;;  %v909_v18 = vsub.f32 %v2007_v50, %v877_v44  ;;  %1427 = vpow2.f32 %v964_v16  ;;  %v966_v57 = vmul.f32 1.442695, %v915_v45 }
 0x331   :  { %v2117_v6 = vpop.eup %1423  ;;  %v1104_v4 = vadd.f32 %v2086_v20, %v1076_v48  ;;  %v954_v10 = vmul.f32 1.442695, %v909_v18 }
 0x332   :  { %1014 = vadd.xlane.f32.xlu2 %v2115_v52  ;;  %1004 = vadd.xlane.f32.xlu0 %v2117_v6 }
 0x333   :  { %1130 = vst [vmem:[%s2281_s7 + $0x10] sm:$0xff] %v1104_v4  ;;  %1429 = vpow2.f32 %v954_v10 }
 0x334   :  { %v1426_v50 = vpop.eup %1425  ;;  %1431 = vpow2.f32 %v966_v57 }
 0x335   :  { %v1049_v54 = vmul.f32 %v1426_v50, %v2004_v49  ;;  %v2129_v61 = vpop.eup %1427 }
 0x337   :  { %v1077_v37 = vmul.f32 %v2081_v28, %v1049_v54 }
 0x339   :  { %v2131_v21 = vpop.eup %1429  ;;  %v1105_v59 = vadd.f32 %v2086_v20, %v1077_v37 }
 0x33a   :  { %1016 = vadd.xlane.f32.xlu0 %v2129_v61  ;;  %1006 = vadd.xlane.f32.xlu1 %v2131_v21  ;;  %v2139_v12 = vpop.eup %1431 }
 0x33b   :  { %1131 = vst [vmem:[%s2281_s7 + $0x18] sm:$0xff] %v1105_v59 }
 0x341   :  { %v1009_v49 = vpop.xlane.xlu2 %1008 }
 0x342   :  { %1433 = vrcp.f32 %v1009_v49  ;;  %1018 = vadd.xlane.f32.xlu1 %v2139_v12 }
 0x348   :  { %v1434_v24 = vpop.eup %1433 }
 0x349   :  { %v1066_v3 = vmul.f32 %v1434_v24, %v2013_v55  ;;  %v1011_v23 = vpop.xlane.xlu0 %1010 }
 0x34a   :  { %1435 = vrcp.f32 %v1011_v23 }
 0x34b   :  { %v1094_v62 = vmul.f32 %v2081_v28, %v1066_v3 }
 0x34d   :  { %v1122_v8 = vadd.f32 %v2086_v20, %v1094_v62 }
 0x34f   :  { %1148 = vst [vmem:[%s2281_s7 + $0xa0] sm:$0xff] %v1122_v8 }
 0x350   :  { %v1436_v17 = vpop.eup %1435 }
 0x351   :  { %v1067_v1 = vmul.f32 %v1436_v17, %v2017_v60  ;;  %v1013_v33 = vpop.xlane.xlu1 %1012 }
 0x352   :  { %1437 = vrcp.f32 %v1013_v33 }
 0x353   :  { %v1095_v22 = vmul.f32 %v2081_v28, %v1067_v1 }
 0x355   :  { %v1123_v25 = vadd.f32 %v2086_v20, %v1095_v22 }
 0x357   :  { %1149 = vst [vmem:[%s2281_s7 + $0xa8] sm:$0xff] %v1123_v25 }
 0x358   :  { %v1438_v55 = vpop.eup %1437 }
 0x359   :  { %v1068_v26 = vmul.f32 %v1438_v55, %v2023_v0  ;;  %v977_v29 = vpop.xlane.xlu1 %976 }
 0x35a   :  { %1439 = vrcp.f32 %v977_v29 }
 0x35b   :  { %v1096_v30 = vmul.f32 %v2081_v28, %v1068_v26 }
 0x35d   :  { %v1124_v31 = vadd.f32 %v2086_v20, %v1096_v30 }
 0x35f   :  { %1150 = vst [vmem:[%s2281_s7 + $0xb0] sm:$0xff] %v1124_v31 }
 0x360   :  { %v1440_v60 = vpop.eup %1439 }
 0x361   :  { %v1050_v32 = vmul.f32 %v1440_v60, %v2029_v13  ;;  %v979_v43 = vpop.xlane.xlu2 %978 }
 0x362   :  { %1441 = vrcp.f32 %v979_v43 }
 0x363   :  { %v1078_v9 = vmul.f32 %v2081_v28, %v1050_v32 }
 0x365   :  { %v1106_v40 = vadd.f32 %v2086_v20, %v1078_v9 }
 0x367   :  { %1132 = vst [vmem:[%s2281_s7 + $0x20] sm:$0xff] %v1106_v40 }
 0x368   :  { %v1442_v0 = vpop.eup %1441 }
 0x369   :  { %v981_v34 = vpop.xlane.xlu0 %980  ;;  %v1051_v35 = vmul.f32 %v1442_v0, %v2036_v27 }
 0x36a   :  { %1443 = vrcp.f32 %v981_v34  ;;  %v985_v39 = vpop.xlane.xlu2 %984 }
 0x36b   :  { %1445 = vrcp.f32 %v985_v39  ;;  %v1079_v2 = vmul.f32 %v2081_v28, %v1051_v35 }
 0x36d   :  { %v1107_v13 = vadd.f32 %v2086_v20, %v1079_v2 }
 0x36f   :  { %1133 = vst [vmem:[%s2281_s7 + $0x28] sm:$0xff] %v1107_v13 }
 0x370   :  { %v1444_v56 = vpop.eup %1443 }
 0x371   :  { %v1446_v15 = vpop.eup %1445  ;;  %v1052_v38 = vmul.f32 %v1444_v56, %v2042_v11  ;;  %v987_v41 = vpop.xlane.xlu0 %986 }
 0x372   :  { %v1054_v47 = vmul.f32 %v1446_v15, %v2044_v36  ;;  %1447 = vrcp.f32 %v987_v41  ;;  %v991_v27 = vpop.xlane.xlu2 %990 }
 0x373   :  { %v1080_v16 = vmul.f32 %v2081_v28, %v1052_v38  ;;  %v983_v44 = vpop.xlane.xlu1 %982  ;;  %1449 = vrcp.f32 %v991_v27 }
 0x374   :  { %v1082_v48 = vmul.f32 %v2081_v28, %v1054_v47  ;;  %1451 = vrcp.f32 %v983_v44 }
 0x375   :  { %v1108_v18 = vadd.f32 %v2086_v20, %v1080_v16 }
 0x376   :  { %v1110_v4 = vadd.f32 %v2086_v20, %v1082_v48 }
 0x377   :  { %1134 = vst [vmem:[%s2281_s7 + $0x30] sm:$0xff] %v1108_v18 }
 0x378   :  { %v1448_v11 = vpop.eup %1447  ;;  %1136 = vst [vmem:[%s2281_s7 + $0x40] sm:$0xff] %v1110_v4 }
 0x379   :  { %v1450_v36 = vpop.eup %1449  ;;  %v1055_v10 = vmul.f32 %v1448_v11, %v2050_v42  ;;  %v993_v45 = vpop.xlane.xlu0 %992 }
 0x37a   :  { %v1452_v50 = vpop.eup %1451  ;;  %v1057_v54 = vmul.f32 %v1450_v36, %v2052_v46  ;;  %1453 = vrcp.f32 %v993_v45 }
 0x37b   :  { %v1083_v57 = vmul.f32 %v2081_v28, %v1055_v10  ;;  %v1053_v37 = vmul.f32 %v1452_v50, %v2055_v51  ;;  %v989_v59 = vpop.xlane.xlu1 %988 }
 0x37c   :  { %v1085_v49 = vmul.f32 %v2081_v28, %v1057_v54  ;;  %1455 = vrcp.f32 %v989_v59 }
 0x37d   :  { %v1111_v24 = vadd.f32 %v2086_v20, %v1083_v57  ;;  %v1081_v3 = vmul.f32 %v2081_v28, %v1053_v37 }
 0x37e   :  { %v1113_v23 = vadd.f32 %v2086_v20, %v1085_v49 }
 0x37f   :  { %1137 = vst [vmem:[%s2281_s7 + $0x48] sm:$0xff] %v1111_v24  ;;  %v1109_v42 = vadd.f32 %v2086_v20, %v1081_v3 }
 0x380   :  { %v1454_v46 = vpop.eup %1453  ;;  %1139 = vst [vmem:[%s2281_s7 + $0x58] sm:$0xff] %v1113_v23 }
 0x381   :  { %1135 = vst [vmem:[%s2281_s7 + $0x38] sm:$0xff] %v1109_v42  ;;  %v1058_v51 = vmul.f32 %v1454_v46, %v2060_v19 }
 0x382   :  { %v1456_v62 = vpop.eup %1455 }
 0x383   :  { %v1086_v8 = vmul.f32 %v2081_v28, %v1058_v51  ;;  %v1056_v17 = vmul.f32 %v1456_v62, %v2062_v53  ;;  %v995_v1 = vpop.xlane.xlu1 %994 }
 0x384   :  { %1457 = vrcp.f32 %v995_v1 }
 0x385   :  { %v1114_v33 = vadd.f32 %v2086_v20, %v1086_v8  ;;  %v1084_v22 = vmul.f32 %v2081_v28, %v1056_v17  ;;  %v997_v25 = vpop.xlane.xlu2 %996 }
 0x386   :  { %1459 = vrcp.f32 %v997_v25 }
 0x387   :  { %1140 = vst [vmem:[%s2281_s7 + $0x60] sm:$0xff] %v1114_v33  ;;  %v1112_v55 = vadd.f32 %v2086_v20, %v1084_v22 }
 0x389   :  { %1138 = vst [vmem:[%s2281_s7 + $0x50] sm:$0xff] %v1112_v55 }
 0x38a   :  { %v1458_v19 = vpop.eup %1457 }
 0x38b   :  { %v1059_v53 = vmul.f32 %v1458_v19, %v2067_v58 }
 0x38c   :  { %v1460_v26 = vpop.eup %1459 }
 0x38d   :  { %v1087_v29 = vmul.f32 %v2081_v28, %v1059_v53  ;;  %v1060_v30 = vmul.f32 %v1460_v26, %v2071_v63  ;;  %v999_v31 = vpop.xlane.xlu0 %998 }
 0x38e   :  { %1461 = vrcp.f32 %v999_v31 }
 0x38f   :  { %v1115_v60 = vadd.f32 %v2086_v20, %v1087_v29  ;;  %v1088_v32 = vmul.f32 %v2081_v28, %v1060_v30 }
 0x391   :  { %1141 = vst [vmem:[%s2281_s7 + $0x68] sm:$0xff] %v1115_v60  ;;  %v1116_v43 = vadd.f32 %v2086_v20, %v1088_v32 }
 0x393   :  { %1142 = vst [vmem:[%s2281_s7 + $0x70] sm:$0xff] %v1116_v43 }
 0x394   :  { %v1462_v58 = vpop.eup %1461 }
 0x395   :  { %v1061_v9 = vmul.f32 %v1462_v58, %v2075_v7  ;;  %v1001_v63 = vpop.xlane.xlu1 %1000 }
 0x396   :  { %1463 = vrcp.f32 %v1001_v63 }
 0x397   :  { %v1089_v40 = vmul.f32 %v2081_v28, %v1061_v9 }
 0x399   :  { %v1117_v0 = vadd.f32 %v2086_v20, %v1089_v40 }
 0x39b   :  { %1143 = vst [vmem:[%s2281_s7 + $0x78] sm:$0xff] %v1117_v0 }
 0x39c   :  { %v1464_v34 = vpop.eup %1463 }
 0x39d   :  { %v1062_v35 = vmul.f32 %v1464_v34, %v2091_v5  ;;  %v1003_v39 = vpop.xlane.xlu2 %1002 }
 0x39e   :  { %1465 = vrcp.f32 %v1003_v39 }
 0x39f   :  { %v1090_v2 = vmul.f32 %v2081_v28, %v1062_v35 }
 0x3a1   :  { %v1118_v13 = vadd.f32 %v2086_v20, %v1090_v2 }
 0x3a3   :  { %1144 = vst [vmem:[%s2281_s7 + $0x80] sm:$0xff] %v1118_v13 }
 0x3a4   :  { %v1466_v7 = vpop.eup %1465 }
 0x3a5   :  { %v1063_v56 = vmul.f32 %v1466_v7, %v2103_v14  ;;  %v1005_v15 = vpop.xlane.xlu0 %1004  ;;  %v1015_v38 = vpop.xlane.xlu2 %1014 }
 0x3a6   :  { %1467 = vrcp.f32 %v1005_v15 }
 0x3a7   :  { %v1091_v41 = vmul.f32 %v2081_v28, %v1063_v56  ;;  %1469 = vrcp.f32 %v1015_v38 }
 0x3a9   :  { %v1119_v5 = vadd.f32 %v2086_v20, %v1091_v41 }
 0x3ab   :  { %1145 = vst [vmem:[%s2281_s7 + $0x88] sm:$0xff] %v1119_v5 }
 0x3ac   :  { %v1468_v47 = vpop.eup %1467 }
 0x3ad   :  { %v1470_v27 = vpop.eup %1469  ;;  %v1064_v16 = vmul.f32 %v1468_v47, %v2117_v6  ;;  %v1017_v44 = vpop.xlane.xlu0 %1016 }
 0x3ae   :  { %v1007_v48 = vpop.xlane.xlu1 %1006  ;;  %v1069_v14 = vmul.f32 %v1470_v27, %v2115_v52  ;;  %1471 = vrcp.f32 %v1017_v44 }
 0x3af   :  { %v1092_v18 = vmul.f32 %v2081_v28, %v1064_v16  ;;  %1473 = vrcp.f32 %v1007_v48 }
 0x3b0   :  { %v1097_v4 = vmul.f32 %v2081_v28, %v1069_v14 }
 0x3b1   :  { %v1120_v11 = vadd.f32 %v2086_v20, %v1092_v18 }
 0x3b2   :  { %v1125_v36 = vadd.f32 %v2086_v20, %v1097_v4 }
 0x3b3   :  { %1146 = vst [vmem:[%s2281_s7 + $0x90] sm:$0xff] %v1120_v11 }
 0x3b4   :  { %v1472_v10 = vpop.eup %1471  ;;  %1151 = vst [vmem:[%s2281_s7 + $0xb8] sm:$0xff] %v1125_v36 }
 0x3b5   :  { %v1474_v52 = vpop.eup %1473  ;;  %v1070_v6 = vmul.f32 %v1472_v10, %v2129_v61 }
 0x3b6   :  { %v1019_v45 = vpop.xlane.xlu1 %1018  ;;  %v1065_v50 = vmul.f32 %v1474_v52, %v2131_v21 }
 0x3b7   :  { %1475 = vrcp.f32 %v1019_v45  ;;  %v1098_v54 = vmul.f32 %v2081_v28, %v1070_v6 }
 0x3b8   :  { %v1093_v57 = vmul.f32 %v2081_v28, %v1065_v50 }
 0x3b9   :  { %v1126_v37 = vadd.f32 %v2086_v20, %v1098_v54 }
 0x3ba   :  { %v1121_v59 = vadd.f32 %v2086_v20, %v1093_v57 }
 0x3bb   :  { %1152 = vst [vmem:[%s2281_s7 + $0xc0] sm:$0xff] %v1126_v37 }
 0x3bc   :  { %1147 = vst [vmem:[%s2281_s7 + $0x98] sm:$0xff] %v1121_v59 }
 0x3bd   :  { %v1476_v49 = vpop.eup %1475 }
 0x3be   :  { %v1071_v61 = vmul.f32 %v1476_v49, %v2139_v12 }
 0x3c0   :  { %v1099_v21 = vmul.f32 %v2081_v28, %v1071_v61 }
 0x3c2   :  { %v1127_v24 = vadd.f32 %v2086_v20, %v1099_v21 }
 0x3c4   :  { %1153 = vst [vmem:[%s2281_s7 + $0xc8] sm:$0xff] %v1127_v24 }

</bundles_post_ra>
